<compile_context>
chip_gen: v7x
topology: tpu7x:2x2x1
jax: 0.10.0
libtpu: 0.0.40
codegen_flags: <defaults>
</compile_context>

<pallas_src>
import functools

import jax
import jax.numpy as jnp
from jax.experimental import pallas as pl
from jax.experimental.pallas import tpu as pltpu


def _round_up(x, m):
    return (x + m - 1) // m * m


def _pick_tile(n, max_tile):
    """Largest multiple-of-8 tile <= max_tile that keeps padding minimal.

    Returns (tile, padded_n) with padded_n = tile * num_tiles.
    """
    n8 = _round_up(n, 8)
    n_tiles = pl.cdiv(n8, max_tile)
    tile = _round_up(pl.cdiv(n8, n_tiles), 8)
    return tile, tile * n_tiles


# ---------------------------------------------------------------------------
# Kernel 1: affinity head  (mean over seq axis + Linear(1280, 1))
# ---------------------------------------------------------------------------

def _affinity_kernel(rep_ref, w_ref, b_ref, out_ref, *, inv_len):
    """Per (batch-tile, seq-tile) grid step: out += sum_l (rep_tile @ w).

    rep_ref : (B_TILE, L_TILE, H)  VMEM  bf16
    w_ref   : (H, 1)               VMEM  bf16  (nn.Linear(1280,1).weight^T)
    b_ref   : (1, 1)               SMEM  f32   (bias scalar)
    out_ref : (B_TILE, 1)          VMEM  f32   (resident across the seq axis)
    """
    li = pl.program_id(1)

    @pl.when(li == 0)
    def _():
        out_ref[...] = jnp.zeros_like(out_ref)

    b_tile = rep_ref.shape[0]
    # MXU contraction over H (bf16 operands, f32 accumulation): no f32 block
    # temp, no VPU/XLU pressure; kernel stays DMA-bound.
    w3 = jnp.broadcast_to(w_ref[...], (b_tile,) + w_ref.shape)        # (B_TILE, H, 1)
    partial = jnp.einsum('blh,bho->blo', rep_ref[...], w3,
                         preferred_element_type=jnp.float32)          # (B_TILE, L_TILE, 1)
    out_ref[...] += jnp.sum(partial, axis=1)                          # (B_TILE, 1)

    @pl.when(li == pl.num_programs(1) - 1)
    def _():
        # Divide by the TRUE sequence length (padded rows are zero) and add bias.
        out_ref[...] = out_ref[...] * inv_len + b_ref[0, 0]


@jax.jit
def affinity_head(rep, w_col, b):
    """rep: (B, L, H) bf16, w_col: (H, 1) bf16, b: (1, 1) f32 -> (B, 1) f32."""
    B, L, H = rep.shape
    B_TILE = 8
    B_pad = _round_up(B, B_TILE)
    # L tile capped at 256: (8, 256, 1280) bf16 ≈ 5.24 MiB per buffer,
    # ≈10.5 MiB double-buffered -> safe under v5e's 16 MiB scoped default
    # and v7x's 32 MiB scoped / 64 MiB physical VMEM.
    L_TILE, L_pad = _pick_tile(L, 256)

    if B_pad != B or L_pad != L:
        rep = jnp.pad(rep, ((0, B_pad - B), (0, L_pad - L), (0, 0)))   # zeros: sum-neutral

    kernel = functools.partial(_affinity_kernel, inv_len=1.0 / L)
    out = pl.pallas_call(
        kernel,
        out_shape=jax.ShapeDtypeStruct((B_pad, 1), jnp.float32),
        grid=(B_pad // B_TILE, L_pad // L_TILE),
        in_specs=[
            pl.BlockSpec((B_TILE, L_TILE, H), lambda bi, li: (bi, li, 0)),
            pl.BlockSpec((H, 1), lambda bi, li: (0, 0)),                 # resident weight
            pl.BlockSpec(memory_space=pltpu.MemorySpace.SMEM),           # bias scalar
        ],
        out_specs=pl.BlockSpec((B_TILE, 1), lambda bi, li: (bi, 0)),
        compiler_params=pltpu.CompilerParams(
            dimension_semantics=("parallel", "arbitrary")),
    )(rep, w_col, b)
    return out[:B]


# ---------------------------------------------------------------------------
# Kernel 2: fused lm_head matmul + softmax (likelihood branch)
# ---------------------------------------------------------------------------

def _lm_softmax_kernel(rep_ref, w_ref, out_ref):
    """logits = rep_tile @ lm_head (MXU, f32 acc), then row softmax.

    rep_ref : (ROW_TILE, H)  VMEM bf16
    w_ref   : (H, V)         VMEM bf16 (resident: constant block index)
    out_ref : (ROW_TILE, V)  VMEM f32
    """
    logits = jnp.dot(rep_ref[...], w_ref[...],
                     preferred_element_type=jnp.float32)      # (ROW_TILE, V)
    m = jnp.max(logits, axis=-1, keepdims=True)
    e = jnp.exp(logits - m)
    denom = jnp.sum(e, axis=-1, keepdims=True)
    # Exact reciprocal: one divide per row is negligible and keeps probs tight
    # for downstream ranking / log-probs.
    out_ref[...] = (e / denom).astype(out_ref.dtype)


@jax.jit
def likelihood_head(rep, lm_w):
    """rep: (B, L, H) bf16, lm_w: (H, V) bf16 -> softmax probs (B, L, V) f32."""
    B, L, H = rep.shape
    V = lm_w.shape[1]
    rows = B * L
    # Large row tiles (<=1024) amortize the ~0.35us per-grid-step overhead;
    # 1024x1280 bf16 ≈ 2.6 MiB per buffer -> far under every scoped VMEM limit.
    ROW_TILE, rows_pad = _pick_tile(rows, 1024)

    rep2d = rep.reshape(rows, H)
    if rows_pad != rows:
        rep2d = jnp.pad(rep2d, ((0, rows_pad - rows), (0, 0)))

    # NOTE: V=33 output block is lane-sparse (masked stores); acceptable because
    # the dominant HBM traffic is the (rows, 1280) bf16 rep read, not the output.
    out = pl.pallas_call(
        _lm_softmax_kernel,
        out_shape=jax.ShapeDtypeStruct((rows_pad, V), jnp.float32),
        grid=(rows_pad // ROW_TILE,),
        in_specs=[
            pl.BlockSpec((ROW_TILE, H), lambda r: (r, 0)),
            pl.BlockSpec((H, V), lambda r: (0, 0)),       # full lm_head, stays resident
        ],
        out_specs=pl.BlockSpec((ROW_TILE, V), lambda r: (r, 0)),
        compiler_params=pltpu.CompilerParams(
            dimension_semantics=("parallel",)),
    )(rep2d, lm_w)
    return out[:rows].reshape(B, L, V)


# ---------------------------------------------------------------------------
# AffinityPredictor (JAX glue + Pallas hot path)
# ---------------------------------------------------------------------------

class AffinityPredictorPallas:
    def __init__(self, key, vocab_size=33, hidden=1280):
        self.vocab_size = vocab_size
        self.hidden = hidden
        k_emb, k_lm, k_w, k_b = jax.random.split(key, 4)
        # Deterministic synthetic "encoder" params (stand-in for ESM2).
        # Kept in bf16 so _encode emits bf16 directly -> no standalone cast
        # pass over the (B, L, 1280) representations in HBM.
        self.embed = (jax.random.normal(k_emb, (vocab_size, hidden), jnp.float32)
                      * 0.02).astype(jnp.bfloat16)
        self.lm_head = (jax.random.normal(k_lm, (hidden, vocab_size), jnp.float32)
                        * 0.02).astype(jnp.bfloat16)
        # predictor = nn.Sequential(nn.Linear(1280, 1))
        self.pred_w = jax.random.normal(k_w, (1, hidden), jnp.float32) * 0.02   # (out=1, in=H)
        self.pred_b = jax.random.normal(k_b, (1, 1), jnp.float32) * 0.02
        self.pred_w_col = self.pred_w.T.astype(jnp.bfloat16)                    # (H, 1) for MXU

    def _encode(self, seq):
        # Glue: stand-in for res = self.encoder(seq, repr_layers=[33], ...).
        # Returns "representations[33]" only (bf16); the lm_head -> logits step
        # is fused into the likelihood Pallas kernel (no logits HBM round trip).
        # TODO(synk): while the encoder is a plain embedding gather, the gather
        # itself could be folded into the kernels (PrefetchScalarGridSpec row
        # gather) so rep never materializes in HBM; dropped once real ESM2 is used.
        return self.embed[seq]                 # (B, L, H) bf16

    def forward(self, seq, output_type='affinity'):
        rep = self._encode(seq)
        if output_type == 'affinity':
            return affinity_head(rep, self.pred_w_col, self.pred_b)      # (B, 1)
        elif output_type == 'likelihood':
            return likelihood_head(rep, self.lm_head)                     # (B, L, V)

    __call__ = forward


# ---------------------------------------------------------------------------
# Main
# ---------------------------------------------------------------------------

if __name__ == "__main__":
    key = jax.random.PRNGKey(0)
    k_model, k_seq = jax.random.split(key)

    B, L, V, H = 2, 8, 33, 1280
    model = AffinityPredictorPallas(k_model, vocab_size=V, hidden=H)

    seq = jax.random.randint(k_seq, (B, L), 0, V, dtype=jnp.int32)

    # Affinity branch.
    y = jax.block_until_ready(model(seq, output_type='affinity'))
    # Likelihood branch.
    p = jax.block_until_ready(model(seq, output_type='likelihood'))

    # Pure-JAX reference (same bf16 input precision as the kernels).
    rep_bf = model._encode(seq)
    rep_f32 = rep_bf.astype(jnp.float32)
    w_vec = model.pred_w_col.astype(jnp.float32)[:, 0]                       # (H,)
    y_ref = (rep_f32 * w_vec).sum(axis=(1, 2), keepdims=False) / L + model.pred_b[0, 0]
    y_ref = y_ref[:, None]                                                   # (B, 1)
    logits_ref = rep_f32 @ model.lm_head.astype(jnp.float32)                 # (B, L, V)
    p_ref = jax.nn.softmax(logits_ref, axis=-1)

    assert y.shape == (B, 1)
    assert p.shape == (B, L, V)
    assert jnp.allclose(y, y_ref, atol=1e-4, rtol=1e-4)
    assert jnp.allclose(p, p_ref, atol=1e-4, rtol=0)

    print("KERNEL_OK")
</pallas_src>

<mosaic_0001>
module attributes {stable_mosaic.version = 11 : i64} {
  func.func @_affinity_kernel(%arg0: i32, %arg1: i32, %arg2: memref<8x8x1280xbf16, #tpu.memory_space<vmem>>, %arg3: memref<1280x1xbf16, #tpu.memory_space<vmem>>, %arg4: memref<1x1xf32, #tpu.memory_space<smem>>, %arg5: memref<8x1xf32, #tpu.memory_space<vmem>>) attributes {dimension_semantics = [#tpu.dimension_semantics<parallel>, #tpu.dimension_semantics<arbitrary>], iteration_bounds = array<i64: 1, 1>, scalar_prefetch = 0 : i64, scratch_operands = 0 : i64, tpu.core_type = #tpu.core_type<tc>, window_params = [{transform_indices = @transform_0, window_bounds = array<i64: 8, 8, 1280>}, {pipeline_mode = #tpu.pipeline_mode<synchronous>, transform_indices = @transform_1, window_bounds = array<i64: 1280, 1>}, {transform_indices = @transform_2, window_bounds = array<i64: 1, 1>}, {transform_indices = @transform_3, window_bounds = array<i64: 8, 1>}]} {
    %c0_i32 = arith.constant 0 : i32
    %0 = arith.cmpi eq, %arg1, %c0_i32 : i32
    %1 = arith.extui %0 : i1 to i32
    %c0_i32_0 = arith.constant 0 : i32
    %2 = arith.cmpi ne, %1, %c0_i32_0 : i32
    scf.if %2 {
      %cst_12 = arith.constant 0.000000e+00 : f32
      %15 = vector.broadcast %cst_12 : f32 to vector<8x1xf32>
      %c0_13 = arith.constant 0 : index
      %c0_14 = arith.constant 0 : index
      %16 = vector.load %arg5[%c0_13, %c0_14] : memref<8x1xf32, #tpu.memory_space<vmem>>, vector<8x1xf32>
      tpu.vector_store %arg5[%c0_13, %c0_14], %15 {strides = array<i32>} : memref<8x1xf32, #tpu.memory_space<vmem>>, vector<8x1xf32>,
    } else {
    }
    %c0 = arith.constant 0 : index
    %c0_1 = arith.constant 0 : index
    %3 = vector.load %arg3[%c0, %c0_1] : memref<1280x1xbf16, #tpu.memory_space<vmem>>, vector<1280x1xbf16>
    %4 = vector.shape_cast %3 : vector<1280x1xbf16> to vector<1x1280x1xbf16>
    %5 = vector.broadcast %4 : vector<1x1280x1xbf16> to vector<8x1280x1xbf16>
    %c0_2 = arith.constant 0 : index
    %c0_3 = arith.constant 0 : index
    %c0_4 = arith.constant 0 : index
    %6 = vector.load %arg2[%c0_2, %c0_3, %c0_4] : memref<8x8x1280xbf16, #tpu.memory_space<vmem>>, vector<8x8x1280xbf16>
    "tpu.trace_start"() <{level = 10 : i32, message = "blh,bho->blo"}> : () -> ()
    %cst = arith.constant dense<0.000000e+00> : vector<8x8x1xf32>
    %7 = tpu.matmul %6, %5, %cst {dimension_numbers = #tpu.dot_dimension_numbers<[2], [1], [1], [2], [0, 0, 0, 1, 1, 2], [0], [0]>} : vector<8x8x1280xbf16>, vector<8x1280x1xbf16>, vector<8x8x1xf32> -> vector<8x8x1xf32>
    "tpu.trace_stop"() : () -> ()
    %c0_5 = arith.constant 0 : index
    %c0_6 = arith.constant 0 : index
    %8 = vector.load %arg5[%c0_5, %c0_6] : memref<8x1xf32, #tpu.memory_space<vmem>>, vector<8x1xf32>
    %cst_7 = arith.constant dense<0.000000e+00> : vector<8x1xf32>
    %9 = vector.multi_reduction <add>, %7, %cst_7 [1] : vector<8x8x1xf32> to vector<8x1xf32>
    %10 = arith.addf %8, %9 : vector<8x1xf32>
    %c0_8 = arith.constant 0 : index
    %c0_9 = arith.constant 0 : index
    %11 = vector.load %arg5[%c0_8, %c0_9] : memref<8x1xf32, #tpu.memory_space<vmem>>, vector<8x1xf32>
    tpu.vector_store %arg5[%c0_8, %c0_9], %10 {strides = array<i32>} : memref<8x1xf32, #tpu.memory_space<vmem>>, vector<8x1xf32>,
    %c0_i32_10 = arith.constant 0 : i32
    %12 = arith.cmpi eq, %arg1, %c0_i32_10 : i32
    %13 = arith.extui %12 : i1 to i32
    %c0_i32_11 = arith.constant 0 : i32
    %14 = arith.cmpi ne, %13, %c0_i32_11 : i32
    scf.if %14 {
      %c0_12 = arith.constant 0 : index
      %c0_13 = arith.constant 0 : index
      %15 = vector.load %arg5[%c0_12, %c0_13] : memref<8x1xf32, #tpu.memory_space<vmem>>, vector<8x1xf32>
      %cst_14 = arith.constant 1.250000e-01 : f32
      %16 = vector.broadcast %cst_14 : f32 to vector<8x1xf32>
      %17 = arith.mulf %15, %16 : vector<8x1xf32>
      %c0_15 = arith.constant 0 : index
      %c0_16 = arith.constant 0 : index
      %18 = memref.load %arg4[%c0_15, %c0_16] : memref<1x1xf32, #tpu.memory_space<smem>>
      %19 = vector.broadcast %18 : f32 to vector<8x1xf32>
      %20 = arith.addf %17, %19 : vector<8x1xf32>
      %c0_17 = arith.constant 0 : index
      %c0_18 = arith.constant 0 : index
      %21 = vector.load %arg5[%c0_17, %c0_18] : memref<8x1xf32, #tpu.memory_space<vmem>>, vector<8x1xf32>
      tpu.vector_store %arg5[%c0_17, %c0_18], %20 {strides = array<i32>} : memref<8x1xf32, #tpu.memory_space<vmem>>, vector<8x1xf32>,
    } else {
    }
    return
  }
  func.func @transform_0(%arg0: i32, %arg1: i32) -> (i32, i32, i32) {
    %c0_i32 = arith.constant 0 : i32
    %c0_i32_0 = arith.constant 0 : i32
    return %arg0, %arg1, %c0_i32 : i32, i32, i32
  }
  func.func @transform_1(%arg0: i32, %arg1: i32) -> (i32, i32) {
    %c0_i32 = arith.constant 0 : i32
    %c0_i32_0 = arith.constant 0 : i32
    %c0_i32_1 = arith.constant 0 : i32
    return %c0_i32, %c0_i32_0 : i32, i32
  }
  func.func @transform_2(%arg0: i32, %arg1: i32) -> (i32, i32) {
    %c0_i32 = arith.constant 0 : i32
    %c0_i32_0 = arith.constant 0 : i32
    %c0_i32_1 = arith.constant 0 : i32
    return %c0_i32, %c0_i32_0 : i32, i32
  }
  func.func @transform_3(%arg0: i32, %arg1: i32) -> (i32, i32) {
    %c0_i32 = arith.constant 0 : i32
    %c0_i32_0 = arith.constant 0 : i32
    return %arg0, %c0_i32 : i32, i32
  }
}

</mosaic_0001>

<bundles_post_ra>
// kernel: affinity_head.1
= control target key start
LH: loop header
LB: loop body
LE: loop exit
PB: predicated region body
PF: predicated region fallthrough
CT: control target
= control target key end

     0   :  { %vm20_vm0 = vcmask 7168   ;;  %vm2648_vm1 = vcmask 1041409   ;;  %vm2650_vm2 = vcmask 1042434   ;;  %vm2652_vm3 = vcmask 1043459   ;;  %s5791_s1 = inlined_call_operand.vmem [shape: bf16[1280,1], index: 1, kind: input, shape index: {}]   ;;  %s5792_s0 = inlined_call_operand.vmem [shape: bf16[8,8,1280], index: 0, kind: input, shape index: {}]   ;;  %s5793_s3 = inlined_call_operand.vmem [shape: f32[8,1], index: 3, kind: output, shape index: {}]   ;;  %s5794_s2 = inlined_call_operand.<no memory space> [shape: f32[1,1], index: 2, kind: input, shape index: {}]  }
   0x1   :  { %v4004_v0 = vld [vmem:[%s5791_s1 + $0x40] sm:$0xff]   ;;  %v4027_v4 = vld [vmem:[%s5791_s1 + $0x48] sm:$0xff]   ;;  %v4051_v8 = vld [vmem:[%s5791_s1 + $0x50] sm:$0xff]   ;;  %vm2654_vm4 = vcmask 1044484   ;;  %vm2656_vm5 = vcmask 1045509   ;;  %vm2658_vm6 = vcmask 1046534  }
   0x2   :  { %5957 = vst [vmem:[#allocation3_spill] sm:$0xff] %v4004_v0  ;;  %v4009_v1 = vld [vmem:[%s5791_s1 + $0xc0] sm:$0xff]   ;;  %2838 = vmatprep.subr.bf16.mxu0 %v4004_v0  ;;  %5959 = vst [vmem:[#allocation5_spill] sm:$0xff] %v4027_v4  ;;  %v4033_v5 = vld [vmem:[%s5791_s1 + $0xc8] sm:$0xff]   ;;  %vm2660_vm7 = vcmask 1047559  }
   0x3   :  { %v4015_v2 = vld [vmem:[%s5791_s1] sm:$0xff]   ;;  %2860 = vmatprep.subr.bf16.mxu1 %v4009_v1  ;;  %v4039_v6 = vld [vmem:[%s5791_s1 + $0x8] sm:$0xff]   ;;  %5961 = vst [vmem:[#allocation7_spill] sm:$0xff] %v4051_v8  ;;  %v4057_v9 = vld [vmem:[%s5791_s1 + $0xd0] sm:$0xff]  }
   0x4   :  { %5958 = vst [vmem:[#allocation4_spill] sm:$0xff] %v4015_v2  ;;  %v4021_v3 = vld [vmem:[%s5791_s1 + $0x80] sm:$0xff]   ;;  %2839 = vmatpush3.bf16.msra.mxu0 %v4015_v2  ;;  %5960 = vst [vmem:[#allocation6_spill] sm:$0xff] %v4039_v6  ;;  %v4045_v7 = vld [vmem:[%s5791_s1 + $0x88] sm:$0xff]  }
   0x5   :  { %2861 = vmatpush3.bf16.msra.mxu1 %v4021_v3  ;;  %2840 = vmatprep.subr.bf16.mxu0 %v4027_v4  ;;  %v4063_v10 = vld [vmem:[%s5791_s1 + $0x10] sm:$0xff]   ;;  %v4075_v12 = vld [vmem:[%s5791_s1 + $0x58] sm:$0xff]   ;;  %v4099_v16 = vld [vmem:[%s5791_s1 + $0x60] sm:$0xff]  }
   0x6   :  { %2862 = vmatprep.subr.bf16.mxu1 %v4033_v5  ;;  %5962 = vst [vmem:[#allocation8_spill] sm:$0xff] %v4063_v10  ;;  %v4069_v11 = vld [vmem:[%s5791_s1 + $0x90] sm:$0xff]   ;;  %5963 = vst [vmem:[#allocation9_spill] sm:$0xff] %v4075_v12  ;;  %v4081_v13 = vld [vmem:[%s5791_s1 + $0xd8] sm:$0xff]  }
   0x7   :  { %v4087_v14 = vld [vmem:[%s5791_s1 + $0x18] sm:$0xff]   ;;  %5965 = vst [vmem:[#allocation11_spill] sm:$0xff] %v4099_v16  ;;  %v4105_v17 = vld [vmem:[%s5791_s1 + $0xe0] sm:$0xff]   ;;  %v4123_v20 = vld [vmem:[%s5791_s1 + $0x68] sm:$0xff]  }
   0x8   :  { %2841 = vmatpush3.bf16.msra.mxu0 %v4039_v6  ;;  %5964 = vst [vmem:[#allocation10_spill] sm:$0xff] %v4087_v14  ;;  %v4093_v15 = vld [vmem:[%s5791_s1 + $0x98] sm:$0xff]   ;;  %v4111_v18 = vld [vmem:[%s5791_s1 + $0x20] sm:$0xff]   ;;  %5967 = vst [vmem:[#allocation13_spill] sm:$0xff] %v4123_v20 }
   0x9   :  { %2863 = vmatpush3.bf16.msra.mxu1 %v4045_v7  ;;  %2842 = vmatprep.subr.bf16.mxu0 %v4051_v8  ;;  %5966 = vst [vmem:[#allocation12_spill] sm:$0xff] %v4111_v18  ;;  %v4117_v19 = vld [vmem:[%s5791_s1 + $0xa0] sm:$0xff]   ;;  %v4129_v21 = vld [vmem:[%s5791_s1 + $0xe8] sm:$0xff]   ;;  %v4147_v24 = vld [vmem:[%s5791_s1 + $0x70] sm:$0xff]  }
   0xa   :  { %2864 = vmatprep.subr.bf16.mxu1 %v4057_v9  ;;  %v4135_v22 = vld [vmem:[%s5791_s1 + $0x28] sm:$0xff]   ;;  %5969 = vst [vmem:[#allocation15_spill] sm:$0xff] %v4147_v24  ;;  %v4153_v25 = vld [vmem:[%s5791_s1 + $0xf0] sm:$0xff]   ;;  %v4171_v28 = vld [vmem:[%s5791_s1 + $0x78] sm:$0xff]  }
   0xb   :  { %5968 = vst [vmem:[#allocation14_spill] sm:$0xff] %v4135_v22  ;;  %v4141_v23 = vld [vmem:[%s5791_s1 + $0xa8] sm:$0xff]   ;;  %v4159_v26 = vld [vmem:[%s5791_s1 + $0x30] sm:$0xff]   ;;  %5971 = vst [vmem:[#allocation17_spill] sm:$0xff] %v4171_v28 }
   0xc   :  { %2843 = vmatpush3.bf16.msra.mxu0 %v4063_v10  ;;  %5970 = vst [vmem:[#allocation16_spill] sm:$0xff] %v4159_v26  ;;  %v4165_v27 = vld [vmem:[%s5791_s1 + $0xb0] sm:$0xff]   ;;  %v4177_v29 = vld [vmem:[%s5791_s1 + $0xf8] sm:$0xff]   ;;  %v182_v32 = vld [vmem:[%s5792_s0] sm:$0xff] }
   0xd   :  { %2865 = vmatpush3.bf16.msra.mxu1 %v4069_v11  ;;  %2844 = vmatprep.subr.bf16.mxu0 %v4075_v12  ;;  %v4183_v30 = vld [vmem:[%s5791_s1 + $0x38] sm:$0xff]   ;;  %v183_v33 = vld [vmem:[%s5792_s0 + $0x8] sm:$0xff]  ;;  %v2678_v34 = vcombine.low %v182_v32, %v182_v32  ;;  %v2679_v35 = vcombine.high %v182_v32, %v182_v32  ;;  %v4202_v38 = vld [vmem:[%s5791_s1 + $0x140] sm:$0xff]  }
   0xe   :  { %2866 = vmatprep.subr.bf16.mxu1 %v4081_v13  ;;  %v4189_v31 = vld [vmem:[%s5791_s1 + $0xb8] sm:$0xff]   ;;  %v2680_v36 = vcombine.low %v183_v33, %v183_v33  ;;  %v2681_v37 = vcombine.high %v183_v33, %v183_v33  ;;  %v4207_v39 = vld [vmem:[%s5791_s1 + $0x1c0] sm:$0xff]   ;;  %v4224_v42 = vld [vmem:[%s5791_s1 + $0x148] sm:$0xff]  }
   0xf   :  { %769 = vmatprep.mubr.bf16.mxu0 %v2679_v35  ;;  %v4212_v40 = vld [vmem:[%s5791_s1 + $0x100] sm:$0xff]   ;;  %v4231_v43 = vld [vmem:[%s5791_s1 + $0x1c8] sm:$0xff]   ;;  %v4248_v46 = vld [vmem:[%s5791_s1 + $0x150] sm:$0xff]  }
  0x10   :  { %2845 = vmatpush3.bf16.msra.mxu0 %v4087_v14  ;;  %809 = vmatprep.mubr.bf16.mxu1 %v2681_v37  ;;  %v4217_v41 = vld [vmem:[%s5791_s1 + $0x180] sm:$0xff]   ;;  %v4237_v44 = vld [vmem:[%s5791_s1 + $0x108] sm:$0xff]   ;;  %v4255_v47 = vld [vmem:[%s5791_s1 + $0x1d0] sm:$0xff]  }
  0x11   :  { %2867 = vmatpush3.bf16.msra.mxu1 %v4093_v15  ;;  %2846 = vmatprep.subr.bf16.mxu0 %v4099_v16  ;;  %v4243_v45 = vld [vmem:[%s5791_s1 + $0x188] sm:$0xff]   ;;  %v4261_v48 = vld [vmem:[%s5791_s1 + $0x110] sm:$0xff]   ;;  %v4272_v50 = vld [vmem:[%s5791_s1 + $0x158] sm:$0xff]  }
  0x12   :  { %2868 = vmatprep.subr.bf16.mxu1 %v4105_v17  ;;  %v4267_v49 = vld [vmem:[%s5791_s1 + $0x190] sm:$0xff]   ;;  %v4279_v51 = vld [vmem:[%s5791_s1 + $0x1d8] sm:$0xff]   ;;  %v4296_v54 = vld [vmem:[%s5791_s1 + $0x160] sm:$0xff]  }
  0x13   :  { %v4285_v52 = vld [vmem:[%s5791_s1 + $0x118] sm:$0xff]   ;;  %v4303_v55 = vld [vmem:[%s5791_s1 + $0x1e0] sm:$0xff]   ;;  %v4320_v58 = vld [vmem:[%s5791_s1 + $0x168] sm:$0xff]  }
  0x14   :  { %2847 = vmatpush3.bf16.msra.mxu0 %v4111_v18  ;;  %v4291_v53 = vld [vmem:[%s5791_s1 + $0x198] sm:$0xff]   ;;  %5972 = vst [vmem:[#allocation18_spill] sm:$0xff] %v4303_v55  ;;  %v4309_v56 = vld [vmem:[%s5791_s1 + $0x120] sm:$0xff]   ;;  %v4327_v59 = vld [vmem:[%s5791_s1 + $0x1e8] sm:$0xff]  }
  0x15   :  { %2869 = vmatpush3.bf16.msra.mxu1 %v4117_v19  ;;  %2848 = vmatprep.subr.bf16.mxu0 %v4123_v20  ;;  %v4315_v57 = vld [vmem:[%s5791_s1 + $0x1a0] sm:$0xff]   ;;  %5974 = vst [vmem:[#allocation20_spill] sm:$0xff] %v4327_v59  ;;  %v4333_v60 = vld [vmem:[%s5791_s1 + $0x128] sm:$0xff]   ;;  %v4344_v62 = vld [vmem:[%s5791_s1 + $0x170] sm:$0xff]  }
  0x16   :  { %2870 = vmatprep.subr.bf16.mxu1 %v4129_v21  ;;  %5973 = vst [vmem:[#allocation19_spill] sm:$0xff] %v4315_v57  ;;  %v4339_v61 = vld [vmem:[%s5791_s1 + $0x1a8] sm:$0xff]   ;;  %v4351_v63 = vld [vmem:[%s5791_s1 + $0x1f0] sm:$0xff]   ;;  %v4375_v35 = vld [vmem:[%s5791_s1 + $0x1f8] sm:$0xff]  }
  0x17   :  { %5975 = vst [vmem:[#allocation21_spill] sm:$0xff] %v4339_v61  ;;  %5976 = vst [vmem:[#allocation22_spill] sm:$0xff] %v4351_v63  ;;  %v4357_v32 = vld [vmem:[%s5791_s1 + $0x130] sm:$0xff]   ;;  %v4387_v37 = vld [vmem:[%s5791_s1 + $0x1b8] sm:$0xff]  }
  0x18   :  { %2849 = vmatpush3.bf16.msra.mxu0 %v4135_v22  ;;  %v4363_v33 = vld [vmem:[%s5791_s1 + $0x1b0] sm:$0xff]   ;;  %5978 = vst [vmem:[#allocation24_spill] sm:$0xff] %v4375_v35  ;;  %5979 = vst [vmem:[#allocation25_spill] sm:$0xff] %v4387_v37 }
  0x19   :  { %2871 = vmatpush3.bf16.msra.mxu1 %v4141_v23  ;;  %2850 = vmatprep.subr.bf16.mxu0 %v4147_v24  ;;  %5977 = vst [vmem:[#allocation23_spill] sm:$0xff] %v4363_v33 }
  0x1a   :  { %2872 = vmatprep.subr.bf16.mxu1 %v4153_v25 }
  0x1c   :  { %2851 = vmatpush3.bf16.msra.mxu0 %v4159_v26 }
  0x1d   :  { %2873 = vmatpush3.bf16.msra.mxu1 %v4165_v27  ;;  %2852 = vmatprep.subr.bf16.mxu0 %v4171_v28 }
  0x1e   :  { %2874 = vmatprep.subr.bf16.mxu1 %v4177_v29 }
  0x20   :  { %2853 = vmatpush3.bf16.msra.mxu0 %v4183_v30 }
  0x21   :  { %2875 = vmatpush3.bf16.msra.mxu1 %v4189_v31  ;;  %2882 = vmatprep.subr.bf16.mxu0 %v4202_v38 }
  0x22   :  { %2904 = vmatprep.subr.bf16.mxu1 %v4207_v39 }
  0x23   :  { %770 = vmatmul.mubr.bf16.vlgmr.msra.gmra.mrb[0].mxu0 %v2678_v34  ;;  %v4368_v34 = vld [vmem:[%s5791_s1 + $0x178] sm:$0xff]  }
  0x24   :  { %810 = vmatmul.mubr.bf16.vlgmr.msra.gmra.mrb[0].mxu1 %v2680_v36  ;;  %2883 = vmatpush3.bf16.msra.mxu0 %v4212_v40  ;;  %v4381_v36 = vld [vmem:[%s5791_s1 + $0x138] sm:$0xff]  }
  0x25   :  { %2905 = vmatpush3.bf16.msra.mxu1 %v4217_v41  ;;  %2884 = vmatprep.subr.bf16.mxu0 %v4224_v42 }
  0x26   :  { %2906 = vmatprep.subr.bf16.mxu1 %v4231_v43 }
  0x28   :  { %2885 = vmatpush3.bf16.msra.mxu0 %v4237_v44 }
  0x29   :  { %2907 = vmatpush3.bf16.msra.mxu1 %v4243_v45  ;;  %2886 = vmatprep.subr.bf16.mxu0 %v4248_v46 }
  0x2a   :  { %2908 = vmatprep.subr.bf16.mxu1 %v4255_v47 }
  0x2c   :  { %2887 = vmatpush3.bf16.msra.mxu0 %v4261_v48 }
  0x2d   :  { %2909 = vmatpush3.bf16.msra.mxu1 %v4267_v49  ;;  %2888 = vmatprep.subr.bf16.mxu0 %v4272_v50 }
  0x2e   :  { %2910 = vmatprep.subr.bf16.mxu1 %v4279_v51 }
  0x30   :  { %2889 = vmatpush3.bf16.msra.mxu0 %v4285_v52 }
  0x31   :  { %2911 = vmatpush3.bf16.msra.mxu1 %v4291_v53  ;;  %2890 = vmatprep.subr.bf16.mxu0 %v4296_v54 }
  0x32   :  { %2912 = vmatprep.subr.bf16.mxu1 %v4303_v55  ;;  %v4400_v55 = vld [vmem:[%s5791_s1 + $0x240] sm:$0xff]  }
  0x34   :  { %2891 = vmatpush3.bf16.msra.mxu0 %v4309_v56 }
  0x35   :  { %2913 = vmatpush3.bf16.msra.mxu1 %v4315_v57  ;;  %2892 = vmatprep.subr.bf16.mxu0 %v4320_v58 }
  0x36   :  { %2914 = vmatprep.subr.bf16.mxu1 %v4327_v59  ;;  %v185_v59 = vld [vmem:[%s5792_s0 + $0x18] sm:$0xff] }
  0x37   :  { %v2685_v57 = vcombine.high %v185_v59, %v185_v59 }
  0x38   :  { %2893 = vmatpush3.bf16.msra.mxu0 %v4333_v60 }
  0x39   :  { %2915 = vmatpush3.bf16.msra.mxu1 %v4339_v61  ;;  %2894 = vmatprep.subr.bf16.mxu0 %v4344_v62 }
  0x3a   :  { %2916 = vmatprep.subr.bf16.mxu1 %v4351_v63  ;;  %889 = vmatprep.mubr.bf16.mxu1 %v2685_v57  ;;  %v4426_v57 = vld [vmem:[%s5791_s1 + $0x250] sm:$0xff]  }
  0x3b   :  { %5980 = vst [vmem:[#allocation26_spill] sm:$0xff] %v4426_v57 }
  0x3c   :  { %2895 = vmatpush3.bf16.msra.mxu0 %v4357_v32 }
  0x3d   :  { %2917 = vmatpush3.bf16.msra.mxu1 %v4363_v33  ;;  %2896 = vmatprep.subr.bf16.mxu0 %v4368_v34  ;;  %v184_v33 = vld [vmem:[%s5792_s0 + $0x10] sm:$0xff] }
  0x3e   :  { %2918 = vmatprep.subr.bf16.mxu1 %v4375_v35  ;;  %v2682_v63 = vcombine.low %v184_v33, %v184_v33  ;;  %v2683_v61 = vcombine.high %v184_v33, %v184_v33  ;;  %v2684_v35 = vcombine.low %v185_v59, %v185_v59  ;;  %v4406_v33 = vld [vmem:[%s5791_s1 + $0x200] sm:$0xff]   ;;  %v4412_v59 = vld [vmem:[%s5791_s1 + $0x248] sm:$0xff]  }
  0x40   :  { %2897 = vmatpush3.bf16.msra.mxu0 %v4381_v36  ;;  %849 = vmatprep.mubr.bf16.mxu0 %v2683_v61  ;;  %v4419_v61 = vld [vmem:[%s5791_s1 + $0x208] sm:$0xff]  }
  0x41   :  { %2919 = vmatpush3.bf16.msra.mxu1 %v4387_v37  ;;  %2926 = vmatprep.subr.bf16.mxu0 %v4400_v55 }
  0x42   :  { %2948 = vmatprep.subr.bf16.mxu1 %v4004_v0  ;;  %v4474_v0 = vld [vmem:[%s5791_s1 + $0x268] sm:$0xff]  }
  0x43   :  { %850 = vmatmul.mubr.bf16.vlgmr.msra.gmra.mrb[4].mxu0 %v2682_v63  ;;  %v4433_v63 = vld [vmem:[%s5791_s1 + $0x210] sm:$0xff]   ;;  %5986 = vst [vmem:[#allocation32_spill] sm:$0xff] %v4474_v0 }
  0x44   :  { %890 = vmatmul.mubr.bf16.vlgmr.msra.gmra.mrb[4].mxu1 %v2684_v35  ;;  %2927 = vmatpush3.bf16.msra.mxu0 %v4406_v33  ;;  %5981 = vst [vmem:[#allocation27_spill] sm:$0xff] %v4433_v63  ;;  %v4440_v35 = vld [vmem:[%s5791_s1 + $0x258] sm:$0xff]  }
  0x45   :  { %2949 = vmatpush3.bf16.msra.mxu1 %v4015_v2  ;;  %2928 = vmatprep.subr.bf16.mxu0 %v4412_v59  ;;  %5982 = vst [vmem:[#allocation28_spill] sm:$0xff] %v4440_v35 }
  0x46   :  { %2950 = vmatprep.subr.bf16.mxu1 %v4027_v4  ;;  %v186_v4 = vld [vmem:[%s5792_s0 + $0x20] sm:$0xff] }
  0x47   :  { %v2687_v2 = vcombine.high %v186_v4, %v186_v4 }
  0x48   :  { %2929 = vmatpush3.bf16.msra.mxu0 %v4419_v61 }
  0x49   :  { %2951 = vmatpush3.bf16.msra.mxu1 %v4039_v6  ;;  %2930 = vmatprep.subr.bf16.mxu0 %v4426_v57  ;;  %v4447_v6 = vld [vmem:[%s5791_s1 + $0x218] sm:$0xff]  }
  0x4a   :  { %2952 = vmatprep.subr.bf16.mxu1 %v4051_v8  ;;  %5983 = vst [vmem:[#allocation29_spill] sm:$0xff] %v4447_v6  ;;  %v4454_v8 = vld [vmem:[%s5791_s1 + $0x260] sm:$0xff]   ;;  %929 = vmatprep.mubr.bf16.mxu0 %v2687_v2  ;;  %v4495_v2 = vld [vmem:[%s5791_s1 + $0x230] sm:$0xff]  }
  0x4b   :  { %5984 = vst [vmem:[#allocation30_spill] sm:$0xff] %v4454_v8  ;;  %5989 = vst [vmem:[#allocation35_spill] sm:$0xff] %v4495_v2 }
  0x4c   :  { %2931 = vmatpush3.bf16.msra.mxu0 %v4433_v63 }
  0x4d   :  { %2953 = vmatpush3.bf16.msra.mxu1 %v4063_v10  ;;  %2932 = vmatprep.subr.bf16.mxu0 %v4440_v35  ;;  %v187_v10 = vld [vmem:[%s5792_s0 + $0x28] sm:$0xff] }
  0x4e   :  { %2954 = vmatprep.subr.bf16.mxu1 %v4075_v12  ;;  %v4467_v12 = vld [vmem:[%s5791_s1 + $0x220] sm:$0xff]   ;;  %v2769_v37 = vcombine.high %v187_v10, %v187_v10 }
  0x4f   :  { %5985 = vst [vmem:[#allocation31_spill] sm:$0xff] %v4467_v12 }
  0x50   :  { %2933 = vmatpush3.bf16.msra.mxu0 %v4447_v6  ;;  %1004 = vmatprep.mubr.bf16.mxu1 %v2769_v37  ;;  %v4502_v37 = vld [vmem:[%s5791_s1 + $0x278] sm:$0xff]  }
  0x51   :  { %2955 = vmatpush3.bf16.msra.mxu1 %v4087_v14  ;;  %2934 = vmatprep.subr.bf16.mxu0 %v4454_v8  ;;  %v4481_v14 = vld [vmem:[%s5791_s1 + $0x228] sm:$0xff]   ;;  %5990 = vst [vmem:[#allocation36_spill] sm:$0xff] %v4502_v37 }
  0x52   :  { %2956 = vmatprep.subr.bf16.mxu1 %v4099_v16  ;;  %5987 = vst [vmem:[#allocation33_spill] sm:$0xff] %v4481_v14  ;;  %v4488_v16 = vld [vmem:[%s5791_s1 + $0x270] sm:$0xff]  }
  0x53   :  { %5988 = vst [vmem:[#allocation34_spill] sm:$0xff] %v4488_v16 }
  0x54   :  { %2935 = vmatpush3.bf16.msra.mxu0 %v4467_v12 }
  0x55   :  { %2957 = vmatpush3.bf16.msra.mxu1 %v4111_v18  ;;  %2936 = vmatprep.subr.bf16.mxu0 %v4474_v0  ;;  %v188_v18 = vld [vmem:[%s5792_s0 + $0x30] sm:$0xff] }
  0x56   :  { %2958 = vmatprep.subr.bf16.mxu1 %v4123_v20  ;;  %v2686_v20 = vcombine.low %v186_v4, %v186_v4  ;;  %v2770_v4 = vcombine.low %v188_v18, %v188_v18 }
  0x58   :  { %2937 = vmatpush3.bf16.msra.mxu0 %v4481_v14 }
  0x59   :  { %2959 = vmatpush3.bf16.msra.mxu1 %v4135_v22  ;;  %2938 = vmatprep.subr.bf16.mxu0 %v4488_v16  ;;  %v4509_v22 = vld [vmem:[%s5791_s1 + $0x238] sm:$0xff]  }
  0x5a   :  { %2960 = vmatprep.subr.bf16.mxu1 %v4147_v24  ;;  %v2768_v24 = vcombine.low %v187_v10, %v187_v10 }
  0x5c   :  { %2939 = vmatpush3.bf16.msra.mxu0 %v4495_v2  ;;  %v189_v2 = vld [vmem:[%s5792_s0 + $0x38] sm:$0xff] }
  0x5d   :  { %2961 = vmatpush3.bf16.msra.mxu1 %v4159_v26  ;;  %2940 = vmatprep.subr.bf16.mxu0 %v4502_v37  ;;  %v2771_v26 = vcombine.high %v188_v18, %v188_v18  ;;  %v2772_v10 = vcombine.low %v189_v2, %v189_v2  ;;  %v5991_v18 = vld [vmem:[#allocation18_spill] sm:$0xff] }
  0x5e   :  { %2962 = vmatprep.subr.bf16.mxu1 %v4171_v28  ;;  %v2773_v28 = vcombine.high %v189_v2, %v189_v2  ;;  %v5992_v2 = vld [vmem:[#allocation19_spill] sm:$0xff] }
  0x60   :  { %2941 = vmatpush3.bf16.msra.mxu0 %v4509_v22 }
  0x61   :  { %2963 = vmatpush3.bf16.msra.mxu1 %v4183_v30  ;;  %2970 = vmatprep.subr.bf16.mxu0 %v4009_v1 }
  0x62   :  { %2992 = vmatprep.subr.bf16.mxu1 %v4202_v38 }
  0x63   :  { %930 = vmatmul.mubr.bf16.vlgmr.msra.gmra.mrb[8].mxu0 %v2686_v20  ;;  %v190_v20 = vld [vmem:[%s5792_s0 + $0x40] sm:$0xff] }
  0x64   :  { %1005 = vmatmul.mubr.bf16.vlgmr.msra.gmra.mrb[8].mxu1 %v2768_v24  ;;  %2971 = vmatpush3.bf16.msra.mxu0 %v4021_v3  ;;  %v191_v24 = vld [vmem:[%s5792_s0 + $0x48] sm:$0xff] }
  0x65   :  { %2993 = vmatpush3.bf16.msra.mxu1 %v4212_v40  ;;  %2972 = vmatprep.subr.bf16.mxu0 %v4033_v5 }
  0x66   :  { %2994 = vmatprep.subr.bf16.mxu1 %v4224_v42  ;;  %1044 = vmatprep.mubr.bf16.mxu0 %v2771_v26  ;;  %v2775_v26 = vcombine.high %v190_v20, %v190_v20 }
  0x67   :  { %1084 = vmatprep.mubr.bf16.mxu1 %v2773_v28  ;;  %v2777_v28 = vcombine.high %v191_v24, %v191_v24 }
  0x68   :  { %2973 = vmatpush3.bf16.msra.mxu0 %v4045_v7 }
  0x69   :  { %2995 = vmatpush3.bf16.msra.mxu1 %v4237_v44  ;;  %2974 = vmatprep.subr.bf16.mxu0 %v4057_v9 }
  0x6a   :  { %2996 = vmatprep.subr.bf16.mxu1 %v4248_v46 }
  0x6c   :  { %2975 = vmatpush3.bf16.msra.mxu0 %v4069_v11 }
  0x6d   :  { %2997 = vmatpush3.bf16.msra.mxu1 %v4261_v48  ;;  %2976 = vmatprep.subr.bf16.mxu0 %v4081_v13 }
  0x6e   :  { %2998 = vmatprep.subr.bf16.mxu1 %v4272_v50 }
  0x70   :  { %2977 = vmatpush3.bf16.msra.mxu0 %v4093_v15 }
  0x71   :  { %2999 = vmatpush3.bf16.msra.mxu1 %v4285_v52  ;;  %2978 = vmatprep.subr.bf16.mxu0 %v4105_v17 }
  0x72   :  { %3000 = vmatprep.subr.bf16.mxu1 %v4296_v54 }
  0x74   :  { %2979 = vmatpush3.bf16.msra.mxu0 %v4117_v19 }
  0x75   :  { %3001 = vmatpush3.bf16.msra.mxu1 %v4309_v56  ;;  %2980 = vmatprep.subr.bf16.mxu0 %v4129_v21 }
  0x76   :  { %3002 = vmatprep.subr.bf16.mxu1 %v4320_v58 }
  0x78   :  { %2981 = vmatpush3.bf16.msra.mxu0 %v4141_v23 }
  0x79   :  { %3003 = vmatpush3.bf16.msra.mxu1 %v4333_v60  ;;  %2982 = vmatprep.subr.bf16.mxu0 %v4153_v25 }
  0x7a   :  { %3004 = vmatprep.subr.bf16.mxu1 %v4344_v62 }
  0x7c   :  { %2983 = vmatpush3.bf16.msra.mxu0 %v4165_v27 }
  0x7d   :  { %3005 = vmatpush3.bf16.msra.mxu1 %v4357_v32  ;;  %2984 = vmatprep.subr.bf16.mxu0 %v4177_v29 }
  0x7e   :  { %3006 = vmatprep.subr.bf16.mxu1 %v4368_v34 }
  0x80   :  { %2985 = vmatpush3.bf16.msra.mxu0 %v4189_v31 }
  0x81   :  { %3007 = vmatpush3.bf16.msra.mxu1 %v4381_v36  ;;  %3014 = vmatprep.subr.bf16.mxu0 %v4207_v39 }
  0x82   :  { %3036 = vmatprep.subr.bf16.mxu1 %v4400_v55 }
  0x83   :  { %1045 = vmatmul.mubr.bf16.vlgmr.msra.gmra.mrb[12].mxu0 %v2770_v4  ;;  %v5993_v4 = vld [vmem:[#allocation20_spill] sm:$0xff] }
  0x84   :  { %1085 = vmatmul.mubr.bf16.vlgmr.msra.gmra.mrb[12].mxu1 %v2772_v10  ;;  %3015 = vmatpush3.bf16.msra.mxu0 %v4217_v41  ;;  %v5994_v10 = vld [vmem:[#allocation21_spill] sm:$0xff] }
  0x85   :  { %3037 = vmatpush3.bf16.msra.mxu1 %v4406_v33  ;;  %3016 = vmatprep.subr.bf16.mxu0 %v4231_v43 }
  0x86   :  { %3038 = vmatprep.subr.bf16.mxu1 %v4412_v59  ;;  %1124 = vmatprep.mubr.bf16.mxu0 %v2775_v26  ;;  %v5995_v26 = vld [vmem:[#allocation22_spill] sm:$0xff] }
  0x87   :  { %1164 = vmatprep.mubr.bf16.mxu1 %v2777_v28  ;;  %v5996_v28 = vld [vmem:[#allocation23_spill] sm:$0xff] }
  0x88   :  { %3017 = vmatpush3.bf16.msra.mxu0 %v4243_v45 }
  0x89   :  { %3039 = vmatpush3.bf16.msra.mxu1 %v4419_v61  ;;  %3018 = vmatprep.subr.bf16.mxu0 %v4255_v47 }
  0x8a   :  { %3040 = vmatprep.subr.bf16.mxu1 %v4426_v57  ;;  %v6003_v57 = vld [vmem:[#allocation6_spill] sm:$0xff] }
  0x8c   :  { %3019 = vmatpush3.bf16.msra.mxu0 %v4267_v49 }
  0x8d   :  { %3041 = vmatpush3.bf16.msra.mxu1 %v4433_v63  ;;  %3020 = vmatprep.subr.bf16.mxu0 %v4279_v51  ;;  %v5999_v63 = vld [vmem:[#allocation25_spill] sm:$0xff] }
  0x8e   :  { %3042 = vmatprep.subr.bf16.mxu1 %v4440_v35  ;;  %v2776_v35 = vcombine.low %v191_v24, %v191_v24  ;;  %v6002_v24 = vld [vmem:[#allocation5_spill] sm:$0xff] }
  0x90   :  { %3021 = vmatpush3.bf16.msra.mxu0 %v4291_v53 }
  0x91   :  { %3043 = vmatpush3.bf16.msra.mxu1 %v4447_v6  ;;  %3022 = vmatprep.subr.bf16.mxu0 %v5991_v18  ;;  %v5997_v6 = vld [vmem:[#allocation35_spill] sm:$0xff] }
  0x92   :  { %3044 = vmatprep.subr.bf16.mxu1 %v4454_v8  ;;  %v5998_v8 = vld [vmem:[#allocation24_spill] sm:$0xff] }
  0x94   :  { %3023 = vmatpush3.bf16.msra.mxu0 %v5992_v2 }
  0x95   :  { %3045 = vmatpush3.bf16.msra.mxu1 %v4467_v12  ;;  %3024 = vmatprep.subr.bf16.mxu0 %v5993_v4  ;;  %v2774_v12 = vcombine.low %v190_v20, %v190_v20  ;;  %v6001_v20 = vld [vmem:[#allocation4_spill] sm:$0xff] }
  0x96   :  { %3046 = vmatprep.subr.bf16.mxu1 %v4474_v0  ;;  %v192_v0 = vld [vmem:[%s5792_s0 + $0x50] sm:$0xff] }
  0x98   :  { %3025 = vmatpush3.bf16.msra.mxu0 %v5994_v10 }
  0x99   :  { %3047 = vmatpush3.bf16.msra.mxu1 %v4481_v14  ;;  %3026 = vmatprep.subr.bf16.mxu0 %v5995_v26  ;;  %v193_v14 = vld [vmem:[%s5792_s0 + $0x58] sm:$0xff] }
  0x9a   :  { %3048 = vmatprep.subr.bf16.mxu1 %v4488_v16  ;;  %v6000_v16 = vld [vmem:[#allocation3_spill] sm:$0xff] }
  0x9c   :  { %3027 = vmatpush3.bf16.msra.mxu0 %v5996_v28 }
  0x9d   :  { %3049 = vmatpush3.bf16.msra.mxu1 %v5997_v6  ;;  %3028 = vmatprep.subr.bf16.mxu0 %v5998_v8  ;;  %v2779_v6 = vcombine.high %v192_v0, %v192_v0 }
  0x9e   :  { %3050 = vmatprep.subr.bf16.mxu1 %v4502_v37  ;;  %v2781_v37 = vcombine.high %v193_v14, %v193_v14 }
  0xa0   :  { %3029 = vmatpush3.bf16.msra.mxu0 %v5999_v63 }
  0xa1   :  { %3051 = vmatpush3.bf16.msra.mxu1 %v4509_v22  ;;  %3058 = vmatprep.subr.bf16.mxu0 %v6000_v16  ;;  %v6004_v16 = vld [vmem:[#allocation7_spill] sm:$0xff] }
  0xa2   :  { %3080 = vmatprep.subr.bf16.mxu1 %v4009_v1  ;;  %v6005_v1 = vld [vmem:[#allocation8_spill] sm:$0xff] }
  0xa3   :  { %1125 = vmatmul.mubr.bf16.vlgmr.msra.gmra.mrb[16].mxu0 %v2774_v12  ;;  %v6006_v12 = vld [vmem:[#allocation9_spill] sm:$0xff] }
  0xa4   :  { %1165 = vmatmul.mubr.bf16.vlgmr.msra.gmra.mrb[16].mxu1 %v2776_v35  ;;  %3059 = vmatpush3.bf16.msra.mxu0 %v6001_v20  ;;  %v4692_v20 = vld [vmem:[%s5791_s1] sm:$0xff]  }
  0xa5   :  { %3081 = vmatpush3.bf16.msra.mxu1 %v4021_v3  ;;  %3060 = vmatprep.subr.bf16.mxu0 %v6002_v24  ;;  %v6007_v3 = vld [vmem:[#allocation10_spill] sm:$0xff]  ;;  %6016 = vst [vmem:[#allocation19_spill] sm:$0xff] %v4692_v20  ;;  %v4699_v24 = vld [vmem:[%s5791_s1 + $0x48] sm:$0xff]  }
  0xa6   :  { %3082 = vmatprep.subr.bf16.mxu1 %v4033_v5  ;;  %1239 = vmatprep.mubr.bf16.mxu0 %v2779_v6  ;;  %v6008_v5 = vld [vmem:[#allocation11_spill] sm:$0xff]  ;;  %v6009_v6 = vld [vmem:[#allocation12_spill] sm:$0xff]  ;;  %6017 = vst [vmem:[#allocation20_spill] sm:$0xff] %v4699_v24 }
  0xa7   :  { %1279 = vmatprep.mubr.bf16.mxu1 %v2781_v37 }
  0xa8   :  { %3061 = vmatpush3.bf16.msra.mxu0 %v6003_v57  ;;  %v4681_v57 = vld [vmem:[%s5791_s1 + $0x40] sm:$0xff]  }
  0xa9   :  { %3083 = vmatpush3.bf16.msra.mxu1 %v4045_v7  ;;  %3062 = vmatprep.subr.bf16.mxu0 %v6004_v16  ;;  %v6010_v7 = vld [vmem:[#allocation13_spill] sm:$0xff]  ;;  %6015 = vst [vmem:[#allocation18_spill] sm:$0xff] %v4681_v57  ;;  %v4706_v16 = vld [vmem:[%s5791_s1 + $0x8] sm:$0xff]  }
  0xaa   :  { %3084 = vmatprep.subr.bf16.mxu1 %v4057_v9  ;;  %v6011_v9 = vld [vmem:[#allocation14_spill] sm:$0xff]  ;;  %6018 = vst [vmem:[#allocation21_spill] sm:$0xff] %v4706_v16 }
  0xac   :  { %3063 = vmatpush3.bf16.msra.mxu0 %v6005_v1 }
  0xad   :  { %3085 = vmatpush3.bf16.msra.mxu1 %v4069_v11  ;;  %3064 = vmatprep.subr.bf16.mxu0 %v6006_v12  ;;  %v6012_v11 = vld [vmem:[#allocation15_spill] sm:$0xff] }
  0xae   :  { %3086 = vmatprep.subr.bf16.mxu1 %v4081_v13  ;;  %v6013_v13 = vld [vmem:[#allocation16_spill] sm:$0xff] }
  0xb0   :  { %3065 = vmatpush3.bf16.msra.mxu0 %v6007_v3 }
  0xb1   :  { %3087 = vmatpush3.bf16.msra.mxu1 %v4093_v15  ;;  %3066 = vmatprep.subr.bf16.mxu0 %v6008_v5  ;;  %v6014_v15 = vld [vmem:[#allocation17_spill] sm:$0xff] }
  0xb2   :  { %3088 = vmatprep.subr.bf16.mxu1 %v4105_v17  ;;  %v2778_v17 = vcombine.low %v192_v0, %v192_v0 }
  0xb4   :  { %3067 = vmatpush3.bf16.msra.mxu0 %v6009_v6 }
  0xb5   :  { %3089 = vmatpush3.bf16.msra.mxu1 %v4117_v19  ;;  %3068 = vmatprep.subr.bf16.mxu0 %v6010_v7  ;;  %v2780_v19 = vcombine.low %v193_v14, %v193_v14 }
  0xb6   :  { %3090 = vmatprep.subr.bf16.mxu1 %v4129_v21  ;;  %v194_v21 = vld [vmem:[%s5792_s0 + $0x60] sm:$0xff] }
  0xb7   :  { %v2782_v0 = vcombine.low %v194_v21, %v194_v21 }
  0xb8   :  { %3069 = vmatpush3.bf16.msra.mxu0 %v6011_v9 }
  0xb9   :  { %3091 = vmatpush3.bf16.msra.mxu1 %v4141_v23  ;;  %3070 = vmatprep.subr.bf16.mxu0 %v6012_v11  ;;  %v195_v23 = vld [vmem:[%s5792_s0 + $0x68] sm:$0xff] }
  0xba   :  { %3092 = vmatprep.subr.bf16.mxu1 %v4153_v25  ;;  %v2783_v25 = vcombine.high %v194_v21, %v194_v21  ;;  %v2784_v14 = vcombine.low %v195_v23, %v195_v23  ;;  %v6021_v21 = vld [vmem:[#allocation27_spill] sm:$0xff] }
  0xbc   :  { %3071 = vmatpush3.bf16.msra.mxu0 %v6013_v13 }
  0xbd   :  { %3093 = vmatpush3.bf16.msra.mxu1 %v4165_v27  ;;  %3072 = vmatprep.subr.bf16.mxu0 %v6014_v15  ;;  %v2785_v27 = vcombine.high %v195_v23, %v195_v23  ;;  %v6022_v23 = vld [vmem:[#allocation28_spill] sm:$0xff] }
  0xbe   :  { %3094 = vmatprep.subr.bf16.mxu1 %v4177_v29  ;;  %v4668_v29 = vld [vmem:[%s5792_s0 + $0x70] sm:$0xff] }
  0xbf   :  { %v2787_v35 = vcombine.high %v4668_v29, %v4668_v29 }
  0xc0   :  { %3073 = vmatpush3.bf16.msra.mxu0 %v4183_v30 }
  0xc1   :  { %3095 = vmatpush3.bf16.msra.mxu1 %v4189_v31  ;;  %3102 = vmatprep.subr.bf16.mxu0 %v4202_v38  ;;  %v4673_v31 = vld [vmem:[%s5792_s0 + $0x78] sm:$0xff] }
  0xc2   :  { %3124 = vmatprep.subr.bf16.mxu1 %v4207_v39  ;;  %v2789_v37 = vcombine.high %v4673_v31, %v4673_v31 }
  0xc3   :  { %1240 = vmatmul.mubr.bf16.vlgmr.msra.gmra.mrb[20].mxu0 %v2778_v17  ;;  %v6019_v17 = vld [vmem:[#allocation26_spill] sm:$0xff] }
  0xc4   :  { %1280 = vmatmul.mubr.bf16.vlgmr.msra.gmra.mrb[20].mxu1 %v2780_v19  ;;  %3103 = vmatpush3.bf16.msra.mxu0 %v4212_v40  ;;  %v4713_v19 = vld [vmem:[%s5791_s1 + $0x50] sm:$0xff]  }
  0xc5   :  { %3125 = vmatpush3.bf16.msra.mxu1 %v4217_v41  ;;  %3104 = vmatprep.subr.bf16.mxu0 %v4224_v42  ;;  %6020 = vst [vmem:[#allocation22_spill] sm:$0xff] %v4713_v19 }
  0xc6   :  { %3126 = vmatprep.subr.bf16.mxu1 %v4231_v43  ;;  %1319 = vmatprep.mubr.bf16.mxu0 %v2783_v25  ;;  %v6023_v25 = vld [vmem:[#allocation29_spill] sm:$0xff] }
  0xc7   :  { %1359 = vmatprep.mubr.bf16.mxu1 %v2785_v27  ;;  %v6024_v27 = vld [vmem:[#allocation30_spill] sm:$0xff] }
  0xc8   :  { %3105 = vmatpush3.bf16.msra.mxu0 %v4237_v44 }
  0xc9   :  { %3127 = vmatpush3.bf16.msra.mxu1 %v4243_v45  ;;  %3106 = vmatprep.subr.bf16.mxu0 %v4248_v46 }
  0xca   :  { %3128 = vmatprep.subr.bf16.mxu1 %v4255_v47 }
  0xcc   :  { %3107 = vmatpush3.bf16.msra.mxu0 %v4261_v48 }
  0xcd   :  { %3129 = vmatpush3.bf16.msra.mxu1 %v4267_v49  ;;  %3108 = vmatprep.subr.bf16.mxu0 %v4272_v50 }
  0xce   :  { %3130 = vmatprep.subr.bf16.mxu1 %v4279_v51 }
  0xd0   :  { %3109 = vmatpush3.bf16.msra.mxu0 %v4285_v52 }
  0xd1   :  { %3131 = vmatpush3.bf16.msra.mxu1 %v4291_v53  ;;  %3110 = vmatprep.subr.bf16.mxu0 %v4296_v54 }
  0xd2   :  { %3132 = vmatprep.subr.bf16.mxu1 %v5991_v18 }
  0xd4   :  { %3111 = vmatpush3.bf16.msra.mxu0 %v4309_v56 }
  0xd5   :  { %3133 = vmatpush3.bf16.msra.mxu1 %v5992_v2  ;;  %3112 = vmatprep.subr.bf16.mxu0 %v4320_v58 }
  0xd6   :  { %3134 = vmatprep.subr.bf16.mxu1 %v5993_v4 }
  0xd8   :  { %3113 = vmatpush3.bf16.msra.mxu0 %v4333_v60 }
  0xd9   :  { %3135 = vmatpush3.bf16.msra.mxu1 %v5994_v10  ;;  %3114 = vmatprep.subr.bf16.mxu0 %v4344_v62 }
  0xda   :  { %3136 = vmatprep.subr.bf16.mxu1 %v5995_v26 }
  0xdc   :  { %3115 = vmatpush3.bf16.msra.mxu0 %v4357_v32 }
  0xdd   :  { %3137 = vmatpush3.bf16.msra.mxu1 %v5996_v28  ;;  %3116 = vmatprep.subr.bf16.mxu0 %v4368_v34 }
  0xde   :  { %3138 = vmatprep.subr.bf16.mxu1 %v5998_v8  ;;  %v6029_v8 = vld [vmem:[#allocation35_spill] sm:$0xff] }
  0xe0   :  { %3117 = vmatpush3.bf16.msra.mxu0 %v4381_v36 }
  0xe1   :  { %3139 = vmatpush3.bf16.msra.mxu1 %v5999_v63  ;;  %3146 = vmatprep.subr.bf16.mxu0 %v4400_v55 }
  0xe2   :  { %3168 = vmatprep.subr.bf16.mxu1 %v4681_v57 }
  0xe3   :  { %1320 = vmatmul.mubr.bf16.vlgmr.msra.gmra.mrb[24].mxu0 %v2782_v0  ;;  %v6025_v0 = vld [vmem:[#allocation31_spill] sm:$0xff] }
  0xe4   :  { %1360 = vmatmul.mubr.bf16.vlgmr.msra.gmra.mrb[24].mxu1 %v2784_v14  ;;  %3147 = vmatpush3.bf16.msra.mxu0 %v4406_v33 }
  0xe5   :  { %3169 = vmatpush3.bf16.msra.mxu1 %v4692_v20  ;;  %3148 = vmatprep.subr.bf16.mxu0 %v4412_v59  ;;  %v6027_v20 = vld [vmem:[#allocation33_spill] sm:$0xff] }
  0xe6   :  { %3170 = vmatprep.subr.bf16.mxu1 %v4699_v24  ;;  %1399 = vmatprep.mubr.bf16.mxu0 %v2787_v35 }
  0xe7   :  { %1474 = vmatprep.mubr.bf16.mxu1 %v2789_v37  ;;  %v6026_v37 = vld [vmem:[#allocation32_spill] sm:$0xff] }
  0xe8   :  { %3149 = vmatpush3.bf16.msra.mxu0 %v4419_v61 }
  0xe9   :  { %3171 = vmatpush3.bf16.msra.mxu1 %v4706_v16  ;;  %3150 = vmatprep.subr.bf16.mxu0 %v6019_v17 }
  0xea   :  { %3172 = vmatprep.subr.bf16.mxu1 %v4713_v19 }
  0xec   :  { %3151 = vmatpush3.bf16.msra.mxu0 %v6021_v21 }
  0xed   :  { %3173 = vmatpush3.bf16.msra.mxu1 %v6005_v1  ;;  %3152 = vmatprep.subr.bf16.mxu0 %v6022_v23 }
  0xee   :  { %3174 = vmatprep.subr.bf16.mxu1 %v6006_v12 }
  0xf0   :  { %3153 = vmatpush3.bf16.msra.mxu0 %v6023_v25 }
  0xf1   :  { %3175 = vmatpush3.bf16.msra.mxu1 %v6007_v3  ;;  %3154 = vmatprep.subr.bf16.mxu0 %v6024_v27 }
  0xf2   :  { %3176 = vmatprep.subr.bf16.mxu1 %v6008_v5 }
  0xf4   :  { %3155 = vmatpush3.bf16.msra.mxu0 %v6025_v0 }
  0xf5   :  { %3177 = vmatpush3.bf16.msra.mxu1 %v6009_v6  ;;  %3156 = vmatprep.subr.bf16.mxu0 %v6026_v37  ;;  %v6028_v6 = vld [vmem:[#allocation34_spill] sm:$0xff] }
  0xf6   :  { %v2854_v14 = vpop.f32.mrb[0].mxu0  ;;  %3178 = vmatprep.subr.bf16.mxu1 %v6010_v7  ;;  %v6030_v7 = vld [vmem:[#allocation36_spill] sm:$0xff] }
  0xf7   :  { %v2876_v35 = vpop.f32.mrb[0].mxu1  ;;  %v2855_v1 = vpop.f32.mrb[1].mxu0 }
  0xf8   :  { %v2877_v12 = vpop.f32.mrb[1].mxu1  ;;  %v2856_v19 = vadd.f32 %v2855_v1, %v2854_v14  ;;  %v2857_v24 = vpop.f32.mrb[2].mxu0  ;;  %3157 = vmatpush3.bf16.msra.mxu0 %v6027_v20 }
  0xf9   :  { %v2878_v16 = vadd.f32 %v2877_v12, %v2876_v35  ;;  %v2879_v3 = vpop.f32.mrb[2].mxu1  ;;  %3179 = vmatpush3.bf16.msra.mxu1 %v6011_v9  ;;  %v2858_v5 = vpop.f32.mrb[3].mxu0  ;;  %3158 = vmatprep.subr.bf16.mxu0 %v6028_v6  ;;  %v2786_v24 = vcombine.low %v4668_v29, %v4668_v29  ;;  %v2788_v9 = vcombine.low %v4673_v31, %v4673_v31  ;;  %v4782_v31 = vld [vmem:[%s5791_s1 + $0x88] sm:$0xff]  }
  0xfa   :  { %v2880_v57 = vpop.f32.mrb[3].mxu1  ;;  %3180 = vmatprep.subr.bf16.mxu1 %v6012_v11  ;;  %v4750_v11 = vld [vmem:[%s5792_s0 + $0x88] sm:$0xff] }
  0xfb   :  { %v4730_v63 = vadd.f32 %v2878_v16, %v2856_v19  ;;  %v4745_v57 = vld [vmem:[%s5792_s0 + $0x80] sm:$0xff]  ;;  %v2793_v29 = vcombine.high %v4750_v11, %v4750_v11 }
  0xfc   :  { %3159 = vmatpush3.bf16.msra.mxu0 %v6029_v8 }
  0xfd   :  { %3181 = vmatpush3.bf16.msra.mxu1 %v6013_v13  ;;  %3160 = vmatprep.subr.bf16.mxu0 %v6030_v7  ;;  %v4757_v13 = vld [vmem:[%s5791_s1 + $0xc0] sm:$0xff]  }
  0xfe   :  { %3182 = vmatprep.subr.bf16.mxu1 %v6014_v15  ;;  %v2791_v15 = vcombine.high %v4745_v57, %v4745_v57 }
 0x100   :  { %3161 = vmatpush3.bf16.msra.mxu0 %v4509_v22 }
 0x101   :  { %3183 = vmatpush3.bf16.msra.mxu1 %v4183_v30  ;;  %3190 = vmatprep.subr.bf16.mxu0 %v4757_v13  ;;  %v4768_v30 = vld [vmem:[%s5791_s1 + $0x80] sm:$0xff]  }
 0x102   :  { %3212 = vmatprep.subr.bf16.mxu1 %v4202_v38  ;;  %v4775_v38 = vld [vmem:[%s5791_s1 + $0xc8] sm:$0xff]  }
 0x103   :  { %1400 = vmatmul.mubr.bf16.vlgmr.msra.gmra.mrb[28].mxu0 %v2786_v24 }
 0x104   :  { %1475 = vmatmul.mubr.bf16.vlgmr.msra.gmra.mrb[28].mxu1 %v2788_v9  ;;  %3191 = vmatpush3.bf16.msra.mxu0 %v4768_v30 }
 0x105   :  { %3213 = vmatpush3.bf16.msra.mxu1 %v4212_v40  ;;  %3192 = vmatprep.subr.bf16.mxu0 %v4775_v38  ;;  %v4789_v40 = vld [vmem:[%s5791_s1 + $0xd0] sm:$0xff]  }
 0x106   :  { %3214 = vmatprep.subr.bf16.mxu1 %v4224_v42  ;;  %1514 = vmatprep.mubr.bf16.mxu0 %v2791_v15  ;;  %v4796_v42 = vld [vmem:[%s5791_s1 + $0x90] sm:$0xff]  }
 0x107   :  { %1554 = vmatprep.mubr.bf16.mxu1 %v2793_v29  ;;  %v4853_v29 = vld [vmem:[%s5791_s1 + $0xb0] sm:$0xff]  }
 0x108   :  { %3193 = vmatpush3.bf16.msra.mxu0 %v4782_v31 }
 0x109   :  { %3215 = vmatpush3.bf16.msra.mxu1 %v4237_v44  ;;  %3194 = vmatprep.subr.bf16.mxu0 %v4789_v40  ;;  %v4803_v44 = vld [vmem:[%s5791_s1 + $0xd8] sm:$0xff]  }
 0x10a   :  { %3216 = vmatprep.subr.bf16.mxu1 %v4248_v46  ;;  %v4810_v46 = vld [vmem:[%s5791_s1 + $0x98] sm:$0xff]  }
 0x10c   :  { %3195 = vmatpush3.bf16.msra.mxu0 %v4796_v42 }
 0x10d   :  { %3217 = vmatpush3.bf16.msra.mxu1 %v4261_v48  ;;  %3196 = vmatprep.subr.bf16.mxu0 %v4803_v44  ;;  %v4817_v48 = vld [vmem:[%s5791_s1 + $0xe0] sm:$0xff]  }
 0x10e   :  { %3218 = vmatprep.subr.bf16.mxu1 %v4272_v50  ;;  %v4824_v50 = vld [vmem:[%s5791_s1 + $0xa0] sm:$0xff]  }
 0x110   :  { %3197 = vmatpush3.bf16.msra.mxu0 %v4810_v46 }
 0x111   :  { %3219 = vmatpush3.bf16.msra.mxu1 %v4285_v52  ;;  %3198 = vmatprep.subr.bf16.mxu0 %v4817_v48  ;;  %v4831_v52 = vld [vmem:[%s5791_s1 + $0xe8] sm:$0xff]  }
 0x112   :  { %3220 = vmatprep.subr.bf16.mxu1 %v4296_v54 }
 0x114   :  { %3199 = vmatpush3.bf16.msra.mxu0 %v4824_v50 }
 0x115   :  { %3221 = vmatpush3.bf16.msra.mxu1 %v4309_v56  ;;  %3200 = vmatprep.subr.bf16.mxu0 %v4831_v52  ;;  %v4838_v56 = vld [vmem:[%s5791_s1 + $0xa8] sm:$0xff]  }
 0x116   :  { %3222 = vmatprep.subr.bf16.mxu1 %v4320_v58  ;;  %v2898_v16 = vpop.f32.mrb[4].mxu0  ;;  %v4845_v58 = vld [vmem:[%s5791_s1 + $0xf0] sm:$0xff]  }
 0x117   :  { %v2920_v54 = vpop.f32.mrb[4].mxu1  ;;  %v2899_v19 = vpop.f32.mrb[5].mxu0 }
 0x118   :  { %v2921_v14 = vpop.f32.mrb[5].mxu1  ;;  %v2900_v35 = vadd.f32 %v2899_v19, %v2898_v16  ;;  %v2901_v12 = vpop.f32.mrb[6].mxu0  ;;  %3201 = vmatpush3.bf16.msra.mxu0 %v4838_v56  ;;  %v200_v16 = vld [vmem:[%s5792_s0 + $0x90] sm:$0xff]  ;;  %v4958_v19 = vld [vmem:[%s5791_s1 + $0x18] sm:$0xff]  }
 0x119   :  { %v2922_v1 = vadd.f32 %v2921_v14, %v2920_v54  ;;  %v2923_v3 = vpop.f32.mrb[6].mxu1  ;;  %3223 = vmatpush3.bf16.msra.mxu1 %v4333_v60  ;;  %v2902_v5 = vpop.f32.mrb[7].mxu0  ;;  %3202 = vmatprep.subr.bf16.mxu0 %v4845_v58  ;;  %v4860_v60 = vld [vmem:[%s5791_s1 + $0xf8] sm:$0xff]   ;;  %6042 = vst [vmem:[#allocation6_spill] sm:$0xff] %v4958_v19  ;;  %v4965_v14 = vld [vmem:[%s5791_s1 + $0x60] sm:$0xff]  }
 0x11a   :  { %v2924_v24 = vpop.f32.mrb[7].mxu1  ;;  %3224 = vmatprep.subr.bf16.mxu1 %v4344_v62  ;;  %v852_v9 = vadd.f32 %v2900_v35, %v4730_v63  ;;  %6031 = vst [vmem:[#allocation23_spill] sm:$0xff] %v4860_v60  ;;  %v2790_v62 = vcombine.low %v4745_v57, %v4745_v57  ;;  %v2792_v63 = vcombine.low %v4750_v11, %v4750_v11  ;;  %v4877_v54 = vld [vmem:[%s5791_s1 + $0xb8] sm:$0xff]   ;;  %6043 = vst [vmem:[#allocation7_spill] sm:$0xff] %v4965_v14  ;;  %v4972_v35 = vld [vmem:[%s5791_s1 + $0x20] sm:$0xff]  }
 0x11b   :  { %6032 = vst [vmem:[#allocation3_spill] sm:$0xff] %v4877_v54  ;;  %v4951_v11 = vld [vmem:[%s5791_s1 + $0x58] sm:$0xff]  }
 0x11c   :  { %v892_v15 = vadd.f32 %v2922_v1, %v852_v9  ;;  %3203 = vmatpush3.bf16.msra.mxu0 %v4853_v29  ;;  %6041 = vst [vmem:[#allocation5_spill] sm:$0xff] %v4951_v11  ;;  %v4979_v1 = vld [vmem:[%s5791_s1 + $0x68] sm:$0xff]  }
 0x11d   :  { %3225 = vmatpush3.bf16.msra.mxu1 %v4357_v32  ;;  %3204 = vmatprep.subr.bf16.mxu0 %v4860_v60  ;;  %v201_v32 = vld [vmem:[%s5792_s0 + $0x98] sm:$0xff] }
 0x11e   :  { %3226 = vmatprep.subr.bf16.mxu1 %v4368_v34  ;;  %v2795_v34 = vcombine.high %v200_v16, %v200_v16  ;;  %v2797_v57 = vcombine.high %v201_v32, %v201_v32 }
 0x120   :  { %3205 = vmatpush3.bf16.msra.mxu0 %v4877_v54 }
 0x121   :  { %3227 = vmatpush3.bf16.msra.mxu1 %v4381_v36  ;;  %3234 = vmatprep.subr.bf16.mxu0 %v4207_v39 }
 0x122   :  { %3256 = vmatprep.subr.bf16.mxu1 %v4400_v55 }
 0x123   :  { %1515 = vmatmul.mubr.bf16.vlgmr.msra.gmra.mrb[32].mxu0 %v2790_v62 }
 0x124   :  { %1555 = vmatmul.mubr.bf16.vlgmr.msra.gmra.mrb[32].mxu1 %v2792_v63  ;;  %3235 = vmatpush3.bf16.msra.mxu0 %v4217_v41 }
 0x125   :  { %3257 = vmatpush3.bf16.msra.mxu1 %v4406_v33  ;;  %3236 = vmatprep.subr.bf16.mxu0 %v4231_v43 }
 0x126   :  { %3258 = vmatprep.subr.bf16.mxu1 %v4412_v59  ;;  %1594 = vmatprep.mubr.bf16.mxu0 %v2795_v34  ;;  %v6033_v59 = vld [vmem:[#allocation24_spill] sm:$0xff] }
 0x127   :  { %1634 = vmatprep.mubr.bf16.mxu1 %v2797_v57  ;;  %v4993_v57 = vld [vmem:[%s5791_s1 + $0x70] sm:$0xff]  }
 0x128   :  { %3237 = vmatpush3.bf16.msra.mxu0 %v4243_v45 }
 0x129   :  { %3259 = vmatpush3.bf16.msra.mxu1 %v4419_v61  ;;  %3238 = vmatprep.subr.bf16.mxu0 %v4255_v47  ;;  %v2794_v61 = vcombine.low %v200_v16, %v200_v16  ;;  %v4986_v16 = vld [vmem:[%s5791_s1 + $0x28] sm:$0xff]  }
 0x12a   :  { %3260 = vmatprep.subr.bf16.mxu1 %v6019_v17 }
 0x12c   :  { %3239 = vmatpush3.bf16.msra.mxu0 %v4267_v49 }
 0x12d   :  { %3261 = vmatpush3.bf16.msra.mxu1 %v6021_v21  ;;  %3240 = vmatprep.subr.bf16.mxu0 %v4279_v51  ;;  %v6036_v21 = vld [vmem:[#allocation19_spill] sm:$0xff] }
 0x12e   :  { %3262 = vmatprep.subr.bf16.mxu1 %v6022_v23  ;;  %v6037_v23 = vld [vmem:[#allocation20_spill] sm:$0xff] }
 0x130   :  { %3241 = vmatpush3.bf16.msra.mxu0 %v4291_v53 }
 0x131   :  { %3263 = vmatpush3.bf16.msra.mxu1 %v6023_v25  ;;  %3242 = vmatprep.subr.bf16.mxu0 %v5991_v18  ;;  %v2796_v18 = vcombine.low %v201_v32, %v201_v32  ;;  %v6039_v25 = vld [vmem:[#allocation22_spill] sm:$0xff] }
 0x132   :  { %3264 = vmatprep.subr.bf16.mxu1 %v6024_v27  ;;  %v4944_v27 = vld [vmem:[%s5791_s1 + $0x10] sm:$0xff]  }
 0x133   :  { %6040 = vst [vmem:[#allocation4_spill] sm:$0xff] %v4944_v27 }
 0x134   :  { %3243 = vmatpush3.bf16.msra.mxu0 %v5992_v2  ;;  %v4918_v2 = vld [vmem:[%s5792_s0 + $0xa0] sm:$0xff] }
 0x135   :  { %3265 = vmatpush3.bf16.msra.mxu1 %v6025_v0  ;;  %3244 = vmatprep.subr.bf16.mxu0 %v5993_v4  ;;  %v4923_v4 = vld [vmem:[%s5792_s0 + $0xa8] sm:$0xff] }
 0x136   :  { %3266 = vmatprep.subr.bf16.mxu1 %v6026_v37  ;;  %v2942_v39 = vpop.f32.mrb[8].mxu0  ;;  %v2801_v17 = vcombine.high %v4923_v4, %v4923_v4 }
 0x137   :  { %v2964_v41 = vpop.f32.mrb[8].mxu1  ;;  %v2943_v43 = vpop.f32.mrb[9].mxu0 }
 0x138   :  { %v2965_v45 = vpop.f32.mrb[9].mxu1  ;;  %v2944_v47 = vadd.f32 %v2943_v43, %v2942_v39  ;;  %v2945_v51 = vpop.f32.mrb[10].mxu0  ;;  %3245 = vmatpush3.bf16.msra.mxu0 %v5994_v10  ;;  %v6034_v10 = vld [vmem:[#allocation25_spill] sm:$0xff] }
 0x139   :  { %v4903_v49 = vadd.f32 %v2965_v45, %v2964_v41  ;;  %v2967_v53 = vpop.f32.mrb[10].mxu1  ;;  %3267 = vmatpush3.bf16.msra.mxu1 %v6027_v20  ;;  %v2946_v55 = vpop.f32.mrb[11].mxu0  ;;  %3246 = vmatprep.subr.bf16.mxu0 %v5995_v26  ;;  %v6035_v26 = vld [vmem:[#allocation18_spill] sm:$0xff]  ;;  %v5003_v43 = vld [vmem:[%s5791_s1 + $0x30] sm:$0xff]  }
 0x13a   :  { %v2968_v36 = vpop.f32.mrb[11].mxu1  ;;  %3268 = vmatprep.subr.bf16.mxu1 %v6028_v6  ;;  %v4909_v33 = vadd.f32 %v2944_v47, %v892_v15  ;;  %v5010_v45 = vld [vmem:[%s5791_s1 + $0x78] sm:$0xff]   ;;  %v2798_v47 = vcombine.low %v4918_v2, %v4918_v2  ;;  %v5021_v51 = vld [vmem:[%s5792_s0 + $0xb0] sm:$0xff] }
 0x13b   :  { %v5026_v53 = vld [vmem:[%s5792_s0 + $0xb8] sm:$0xff]  ;;  %v5038_v36 = vld [vmem:[%s5791_s1 + $0x140] sm:$0xff]  }
 0x13c   :  { %3247 = vmatpush3.bf16.msra.mxu0 %v5996_v28  ;;  %v2799_v28 = vcombine.high %v4918_v2, %v4918_v2  ;;  %v5031_v55 = vld [vmem:[%s5791_s1 + $0x38] sm:$0xff]   ;;  %v5054_v2 = vld [vmem:[%s5791_s1 + $0x100] sm:$0xff]  }
 0x13d   :  { %3269 = vmatpush3.bf16.msra.mxu1 %v6029_v8  ;;  %3248 = vmatprep.subr.bf16.mxu0 %v6033_v59  ;;  %v5044_v59 = vld [vmem:[%s5791_s1 + $0x1c0] sm:$0xff]  }
 0x13e   :  { %3270 = vmatprep.subr.bf16.mxu1 %v6030_v7  ;;  %6044 = vst [vmem:[#allocation8_spill] sm:$0xff] %v5044_v59 }
 0x140   :  { %3249 = vmatpush3.bf16.msra.mxu0 %v6034_v10  ;;  %v5066_v10 = vld [vmem:[%s5791_s1 + $0x148] sm:$0xff]  }
 0x141   :  { %3271 = vmatpush3.bf16.msra.mxu1 %v4509_v22  ;;  %3278 = vmatprep.subr.bf16.mxu0 %v6035_v26  ;;  %v6038_v22 = vld [vmem:[#allocation21_spill] sm:$0xff] }
 0x142   :  { %3300 = vmatprep.subr.bf16.mxu1 %v4757_v13 }
 0x143   :  { %1595 = vmatmul.mubr.bf16.vlgmr.msra.gmra.mrb[36].mxu0 %v2794_v61  ;;  %v2803_v61 = vcombine.high %v5021_v51, %v5021_v51 }
 0x144   :  { %1635 = vmatmul.mubr.bf16.vlgmr.msra.gmra.mrb[36].mxu1 %v2796_v18  ;;  %3279 = vmatpush3.bf16.msra.mxu0 %v6036_v21  ;;  %v2805_v18 = vcombine.high %v5026_v53, %v5026_v53 }
 0x145   :  { %3301 = vmatpush3.bf16.msra.mxu1 %v4768_v30  ;;  %3280 = vmatprep.subr.bf16.mxu0 %v6037_v23 }
 0x146   :  { %3302 = vmatprep.subr.bf16.mxu1 %v4775_v38  ;;  %1709 = vmatprep.mubr.bf16.mxu0 %v2799_v28  ;;  %v5072_v28 = vld [vmem:[%s5791_s1 + $0x1c8] sm:$0xff]  }
 0x147   :  { %1749 = vmatprep.mubr.bf16.mxu1 %v2801_v17  ;;  %6046 = vst [vmem:[#allocation10_spill] sm:$0xff] %v5072_v28  ;;  %v5078_v17 = vld [vmem:[%s5791_s1 + $0x108] sm:$0xff]  }
 0x148   :  { %3281 = vmatpush3.bf16.msra.mxu0 %v6038_v22 }
 0x149   :  { %3303 = vmatpush3.bf16.msra.mxu1 %v4782_v31  ;;  %3282 = vmatprep.subr.bf16.mxu0 %v6039_v25 }
 0x14a   :  { %3304 = vmatprep.subr.bf16.mxu1 %v4789_v40 }
 0x14c   :  { %3283 = vmatpush3.bf16.msra.mxu0 %v4944_v27 }
 0x14d   :  { %3305 = vmatpush3.bf16.msra.mxu1 %v4796_v42  ;;  %3284 = vmatprep.subr.bf16.mxu0 %v4951_v11 }
 0x14e   :  { %3306 = vmatprep.subr.bf16.mxu1 %v4803_v44 }
 0x150   :  { %3285 = vmatpush3.bf16.msra.mxu0 %v4958_v19 }
 0x151   :  { %3307 = vmatpush3.bf16.msra.mxu1 %v4810_v46  ;;  %3286 = vmatprep.subr.bf16.mxu0 %v4965_v14 }
 0x152   :  { %3308 = vmatprep.subr.bf16.mxu1 %v4817_v48 }
 0x154   :  { %3287 = vmatpush3.bf16.msra.mxu0 %v4972_v35 }
 0x155   :  { %3309 = vmatpush3.bf16.msra.mxu1 %v4824_v50  ;;  %3288 = vmatprep.subr.bf16.mxu0 %v4979_v1 }
 0x156   :  { %3310 = vmatprep.subr.bf16.mxu1 %v4831_v52  ;;  %v2986_v12 = vpop.f32.mrb[12].mxu0 }
 0x157   :  { %v3008_v3 = vpop.f32.mrb[12].mxu1  ;;  %v2987_v5 = vpop.f32.mrb[13].mxu0 }
 0x158   :  { %v3009_v24 = vpop.f32.mrb[13].mxu1  ;;  %v2988_v9 = vadd.f32 %v2987_v5, %v2986_v12  ;;  %v2989_v62 = vpop.f32.mrb[14].mxu0  ;;  %3289 = vmatpush3.bf16.msra.mxu0 %v4986_v16  ;;  %v5084_v12 = vld [vmem:[%s5791_s1 + $0x188] sm:$0xff]   ;;  %v5096_v5 = vld [vmem:[%s5791_s1 + $0x1d0] sm:$0xff]  }
 0x159   :  { %v3010_v15 = vadd.f32 %v3009_v24, %v3008_v3  ;;  %v3011_v63 = vpop.f32.mrb[14].mxu1  ;;  %3311 = vmatpush3.bf16.msra.mxu1 %v4838_v56  ;;  %v2990_v32 = vpop.f32.mrb[15].mxu0  ;;  %3290 = vmatprep.subr.bf16.mxu0 %v4993_v57  ;;  %6047 = vst [vmem:[#allocation11_spill] sm:$0xff] %v5084_v12  ;;  %v5090_v3 = vld [vmem:[%s5791_s1 + $0x150] sm:$0xff]   ;;  %6048 = vst [vmem:[#allocation12_spill] sm:$0xff] %v5096_v5  ;;  %v5120_v62 = vld [vmem:[%s5791_s1 + $0x1d8] sm:$0xff]  }
 0x15a   :  { %v3012_v34 = vpop.f32.mrb[15].mxu1  ;;  %3312 = vmatprep.subr.bf16.mxu1 %v4845_v58  ;;  %v1047_v39 = vadd.f32 %v2988_v9, %v4903_v49  ;;  %v2800_v49 = vcombine.low %v4923_v4, %v4923_v4  ;;  %v5060_v4 = vld [vmem:[%s5791_s1 + $0x180] sm:$0xff]   ;;  %v5102_v24 = vld [vmem:[%s5791_s1 + $0x110] sm:$0xff]   ;;  %6050 = vst [vmem:[#allocation14_spill] sm:$0xff] %v5120_v62  ;;  %v5126_v63 = vld [vmem:[%s5791_s1 + $0x118] sm:$0xff]  }
 0x15b   :  { %6045 = vst [vmem:[#allocation9_spill] sm:$0xff] %v5060_v4  ;;  %v5108_v9 = vld [vmem:[%s5791_s1 + $0x190] sm:$0xff]   ;;  %v5132_v32 = vld [vmem:[%s5791_s1 + $0x198] sm:$0xff]   ;;  %v5138_v34 = vld [vmem:[%s5791_s1 + $0x160] sm:$0xff]  }
 0x15c   :  { %v4998_v41 = vadd.f32 %v3010_v15, %v1047_v39  ;;  %3291 = vmatpush3.bf16.msra.mxu0 %v5003_v43  ;;  %6049 = vst [vmem:[#allocation13_spill] sm:$0xff] %v5108_v9  ;;  %v5114_v15 = vld [vmem:[%s5791_s1 + $0x158] sm:$0xff]   ;;  %6051 = vst [vmem:[#allocation15_spill] sm:$0xff] %v5132_v32  ;;  %v5144_v39 = vld [vmem:[%s5791_s1 + $0x1e0] sm:$0xff]  }
 0x15d   :  { %3313 = vmatpush3.bf16.msra.mxu1 %v4853_v29  ;;  %3292 = vmatprep.subr.bf16.mxu0 %v5010_v45  ;;  %6052 = vst [vmem:[#allocation16_spill] sm:$0xff] %v5144_v39 }
 0x15e   :  { %3314 = vmatprep.subr.bf16.mxu1 %v4860_v60 }
 0x160   :  { %3293 = vmatpush3.bf16.msra.mxu0 %v5031_v55 }
 0x161   :  { %3315 = vmatpush3.bf16.msra.mxu1 %v4877_v54  ;;  %3322 = vmatprep.subr.bf16.mxu0 %v5038_v36  ;;  %v5182_v54 = vld [vmem:[%s5791_s1 + $0x1a8] sm:$0xff]  }
 0x162   :  { %3344 = vmatprep.subr.bf16.mxu1 %v5044_v59  ;;  %v5176_v59 = vld [vmem:[%s5791_s1 + $0x128] sm:$0xff]   ;;  %6057 = vst [vmem:[#allocation29_spill] sm:$0xff] %v5182_v54 }
 0x163   :  { %1710 = vmatmul.mubr.bf16.vlgmr.msra.gmra.mrb[40].mxu0 %v2798_v47  ;;  %v2584_v47 = vsel %vm20_vm0, %v4909_v33, 0.0  ;;  %v5170_v33 = vld [vmem:[%s5791_s1 + $0x1e8] sm:$0xff]   ;;  %6056 = vst [vmem:[#allocation28_spill] sm:$0xff] %v5176_v59 }
 0x164   :  { %1750 = vmatmul.mubr.bf16.vlgmr.msra.gmra.mrb[40].mxu1 %v2800_v49  ;;  %3323 = vmatpush3.bf16.msra.mxu0 %v5054_v2  ;;  %v5152_v49 = vld [vmem:[%s5791_s1 + $0x120] sm:$0xff]   ;;  %6055 = vst [vmem:[#allocation27_spill] sm:$0xff] %v5170_v33 }
 0x165   :  { %3345 = vmatpush3.bf16.msra.mxu1 %v5060_v4  ;;  %3324 = vmatprep.subr.bf16.mxu0 %v5066_v10 }
 0x166   :  { %3346 = vmatprep.subr.bf16.mxu1 %v5072_v28  ;;  %1789 = vmatprep.mubr.bf16.mxu0 %v2803_v61  ;;  %v5158_v61 = vld [vmem:[%s5791_s1 + $0x1a0] sm:$0xff]  }
 0x167   :  { %1829 = vmatprep.mubr.bf16.mxu1 %v2805_v18  ;;  %6053 = vst [vmem:[#allocation17_spill] sm:$0xff] %v5158_v61  ;;  %v2585_v18 = vrot.slane %v2584_v47, 4 }
 0x168   :  { %3325 = vmatpush3.bf16.msra.mxu0 %v5078_v17 }
 0x169   :  { %3347 = vmatpush3.bf16.msra.mxu1 %v5084_v12  ;;  %3326 = vmatprep.subr.bf16.mxu0 %v5090_v3 }
 0x16a   :  { %3348 = vmatprep.subr.bf16.mxu1 %v5096_v5 }
 0x16c   :  { %3327 = vmatpush3.bf16.msra.mxu0 %v5102_v24 }
 0x16d   :  { %3349 = vmatpush3.bf16.msra.mxu1 %v5108_v9  ;;  %3328 = vmatprep.subr.bf16.mxu0 %v5114_v15 }
 0x16e   :  { %3350 = vmatprep.subr.bf16.mxu1 %v5120_v62 }
 0x170   :  { %3329 = vmatpush3.bf16.msra.mxu0 %v5126_v63 }
 0x171   :  { %3351 = vmatpush3.bf16.msra.mxu1 %v5132_v32  ;;  %3330 = vmatprep.subr.bf16.mxu0 %v5138_v34 }
 0x172   :  { %3352 = vmatprep.subr.bf16.mxu1 %v5144_v39  ;;  %v5164_v39 = vld [vmem:[%s5791_s1 + $0x168] sm:$0xff]  }
 0x173   :  { %6054 = vst [vmem:[#allocation26_spill] sm:$0xff] %v5164_v39 }
 0x174   :  { %3331 = vmatpush3.bf16.msra.mxu0 %v5152_v49 }
 0x175   :  { %3353 = vmatpush3.bf16.msra.mxu1 %v5158_v61  ;;  %3332 = vmatprep.subr.bf16.mxu0 %v5164_v39 }
 0x176   :  { %3354 = vmatprep.subr.bf16.mxu1 %v5170_v33  ;;  %v3030_v32 = vpop.f32.mrb[16].mxu0  ;;  %v2586_v33 = vadd.f32 %v2585_v18, %v2584_v47 }
 0x177   :  { %v3052_v62 = vpop.f32.mrb[16].mxu1  ;;  %v3031_v9 = vpop.f32.mrb[17].mxu0 }
 0x178   :  { %v3053_v5 = vpop.f32.mrb[17].mxu1  ;;  %v3032_v61 = vadd.f32 %v3031_v9, %v3030_v32  ;;  %v3033_v28 = vpop.f32.mrb[18].mxu0  ;;  %3333 = vmatpush3.bf16.msra.mxu0 %v5176_v59  ;;  %v5207_v32 = vld [vmem:[%s5791_s1 + $0x1b0] sm:$0xff]   ;;  %v2587_v47 = vrot.slane %v2586_v33, 2 }
 0x179   :  { %v3054_v12 = vadd.f32 %v3053_v5, %v3052_v62  ;;  %v3055_v4 = vpop.f32.mrb[18].mxu1  ;;  %3355 = vmatpush3.bf16.msra.mxu1 %v5182_v54  ;;  %v3034_v60 = vpop.f32.mrb[19].mxu0  ;;  %v5194_v28 = vld [vmem:[%s5791_s1 + $0x1f0] sm:$0xff]   ;;  %6061 = vst [vmem:[#allocation33_spill] sm:$0xff] %v5207_v32  ;;  %v5252_v54 = vld [vmem:[%s5791_s1 + $0x240] sm:$0xff]  }
 0x17a   :  { %v3056_v9 = vpop.f32.mrb[19].mxu1  ;;  %v5188_v4 = vld [vmem:[%s5791_s1 + $0x170] sm:$0xff]   ;;  %6059 = vst [vmem:[#allocation31_spill] sm:$0xff] %v5194_v28  ;;  %3356 = vmatprep.subr.bf16.mxu1 %v5194_v28  ;;  %v1127_v5 = vadd.f32 %v3032_v61, %v4998_v41  ;;  %v5213_v41 = vld [vmem:[%s5791_s1 + $0x178] sm:$0xff]   ;;  %v5235_v28 = vld [vmem:[%s5792_s0 + $0xc8] sm:$0xff] }
 0x17b   :  { %6058 = vst [vmem:[#allocation30_spill] sm:$0xff] %v5188_v4  ;;  %3334 = vmatprep.subr.bf16.mxu0 %v5188_v4  ;;  %v5201_v60 = vld [vmem:[%s5791_s1 + $0x130] sm:$0xff]   ;;  %6062 = vst [vmem:[#allocation34_spill] sm:$0xff] %v5213_v41  ;;  %v2802_v9 = vcombine.low %v5021_v51, %v5021_v51  ;;  %v5246_v51 = vld [vmem:[%s5791_s1 + $0x1b8] sm:$0xff]  }
 0x17c   :  { %v1167_v62 = vadd.f32 %v3054_v12, %v1127_v5  ;;  %6060 = vst [vmem:[#allocation32_spill] sm:$0xff] %v5201_v60  ;;  %3335 = vmatpush3.bf16.msra.mxu0 %v5201_v60  ;;  %v5219_v12 = vld [vmem:[%s5791_s1 + $0x1f8] sm:$0xff]   ;;  %v2804_v5 = vcombine.low %v5026_v53, %v5026_v53  ;;  %6065 = vst [vmem:[#allocation24_spill] sm:$0xff] %v5246_v51  ;;  %v2588_v53 = vadd.f32 %v2587_v47, %v2586_v33  ;;  %v5263_v33 = vld [vmem:[%s5791_s1 + $0x200] sm:$0xff]  }
 0x17d   :  { %3357 = vmatpush3.bf16.msra.mxu1 %v5207_v32  ;;  %3336 = vmatprep.subr.bf16.mxu0 %v5213_v41  ;;  %6063 = vst [vmem:[#allocation35_spill] sm:$0xff] %v5219_v12  ;;  %v5230_v32 = vld [vmem:[%s5792_s0 + $0xc0] sm:$0xff]  ;;  %6066 = vst [vmem:[#allocation25_spill] sm:$0xff] %v5252_v54  ;;  %v2809_v41 = vcombine.high %v5235_v28, %v5235_v28 }
 0x17e   :  { %3358 = vmatprep.subr.bf16.mxu1 %v5219_v12  ;;  %v2591_v61 = vsel %vm20_vm0, %v1167_v62, 0.0  ;;  %v5240_v62 = vld [vmem:[%s5791_s1 + $0x138] sm:$0xff]   ;;  %6067 = vst [vmem:[#allocation18_spill] sm:$0xff] %v5263_v33  ;;  %v2589_v47 = vrot.slane %v2588_v53, 1 }
 0x17f   :  { %v2592_v18 = vrot.slane %v2591_v61, 4  ;;  %6064 = vst [vmem:[#allocation36_spill] sm:$0xff] %v5240_v62 }
 0x180   :  { %3337 = vmatpush3.bf16.msra.mxu0 %v5240_v62  ;;  %v2807_v62 = vcombine.high %v5230_v32, %v5230_v32 }
 0x181   :  { %3359 = vmatpush3.bf16.msra.mxu1 %v5246_v51  ;;  %v2593_v12 = vadd.f32 %v2592_v18, %v2591_v61  ;;  %3366 = vmatprep.subr.bf16.mxu0 %v5252_v54  ;;  %v5270_v18 = vld [vmem:[%s5791_s1 + $0x248] sm:$0xff]  }
 0x182   :  { %3388 = vmatprep.subr.bf16.mxu1 %v6035_v26  ;;  %6068 = vst [vmem:[#allocation20_spill] sm:$0xff] %v5270_v18 }
 0x183   :  { %v2594_v60 = vrot.slane %v2593_v12, 2  ;;  %1790 = vmatmul.mubr.bf16.vlgmr.msra.gmra.mrb[44].mxu0 %v2802_v9 }
 0x184   :  { %1830 = vmatmul.mubr.bf16.vlgmr.msra.gmra.mrb[44].mxu1 %v2804_v5  ;;  %3367 = vmatpush3.bf16.msra.mxu0 %v5263_v33  ;;  %v5277_v5 = vld [vmem:[%s5791_s1 + $0x208] sm:$0xff]  }
 0x185   :  { %3389 = vmatpush3.bf16.msra.mxu1 %v6036_v21  ;;  %v2595_v61 = vadd.f32 %v2594_v60, %v2593_v12  ;;  %3368 = vmatprep.subr.bf16.mxu0 %v5270_v18  ;;  %6069 = vst [vmem:[#allocation21_spill] sm:$0xff] %v5277_v5  ;;  %v2590_v60 = vadd.f32 %v2589_v47, %v2588_v53  ;;  %v5284_v21 = vld [vmem:[%s5791_s1 + $0x250] sm:$0xff]   ;;  %v5300_v53 = vld [vmem:[%s5791_s1 + $0x258] sm:$0xff]  }
 0x186   :  { %3390 = vmatprep.subr.bf16.mxu1 %v6037_v23  ;;  %1869 = vmatprep.mubr.bf16.mxu0 %v2807_v62  ;;  %6070 = vst [vmem:[#allocation37_spill] sm:$0xff] %v5284_v21  ;;  %v5293_v62 = vld [vmem:[%s5791_s1 + $0x210] sm:$0xff]   ;;  %6073 = vst [vmem:[#allocation40_spill] sm:$0xff] %v5300_v53  ;;  %v5307_v47 = vld [vmem:[%s5791_s1 + $0x218] sm:$0xff]  }
 0x187   :  { %1944 = vmatprep.mubr.bf16.mxu1 %v2809_v41  ;;  %v2596_v9 = vrot.slane %v2595_v61, 1  ;;  %6072 = vst [vmem:[#allocation39_spill] sm:$0xff] %v5293_v62  ;;  %6074 = vst [vmem:[#allocation41_spill] sm:$0xff] %v5307_v47 }
 0x188   :  { %3369 = vmatpush3.bf16.msra.mxu0 %v5277_v5 }
 0x189   :  { %3391 = vmatpush3.bf16.msra.mxu1 %v6038_v22  ;;  %v2597_v12 = vadd.f32 %v2596_v9, %v2595_v61  ;;  %3370 = vmatprep.subr.bf16.mxu0 %v5284_v21  ;;  %v5314_v61 = vld [vmem:[%s5791_s1 + $0x260] sm:$0xff]  }
 0x18a   :  { %3392 = vmatprep.subr.bf16.mxu1 %v6039_v25  ;;  %6075 = vst [vmem:[#allocation42_spill] sm:$0xff] %v5314_v61 }
 0x18b   :  { %v5288_v41 = vsel %vm2648_vm1, %v2597_v12, %v2590_v60 }
 0x18c   :  { %6071 = vst [vmem:[#allocation38_spill] sm:$0xff] %v5288_v41  ;;  %3371 = vmatpush3.bf16.msra.mxu0 %v5293_v62 }
 0x18d   :  { %3393 = vmatpush3.bf16.msra.mxu1 %v4944_v27  ;;  %3372 = vmatprep.subr.bf16.mxu0 %v5300_v53 }
 0x18e   :  { %3394 = vmatprep.subr.bf16.mxu1 %v4951_v11 }
 0x190   :  { %3373 = vmatpush3.bf16.msra.mxu0 %v5307_v47 }
 0x191   :  { %3395 = vmatpush3.bf16.msra.mxu1 %v4958_v19  ;;  %3374 = vmatprep.subr.bf16.mxu0 %v5314_v61 }
 0x192   :  { %3396 = vmatprep.subr.bf16.mxu1 %v4965_v14 }
 0x194   :  { %3375 = vmatpush3.bf16.msra.mxu0 %v6025_v0 }
 0x195   :  { %3397 = vmatpush3.bf16.msra.mxu1 %v4972_v35  ;;  %3376 = vmatprep.subr.bf16.mxu0 %v6026_v37 }
 0x196   :  { %3398 = vmatprep.subr.bf16.mxu1 %v4979_v1  ;;  %v3074_v9 = vpop.f32.mrb[20].mxu0 }
 0x197   :  { %v3096_v60 = vpop.f32.mrb[20].mxu1  ;;  %v3075_v12 = vpop.f32.mrb[21].mxu0 }
 0x198   :  { %v3097_v19 = vpop.f32.mrb[21].mxu1  ;;  %v3076_v11 = vadd.f32 %v3075_v12, %v3074_v9  ;;  %v3077_v25 = vpop.f32.mrb[22].mxu0  ;;  %3377 = vmatpush3.bf16.msra.mxu0 %v6027_v20  ;;  %v2806_v20 = vcombine.low %v5230_v32, %v5230_v32 }
 0x199   :  { %v3098_v27 = vadd.f32 %v3097_v19, %v3096_v60  ;;  %v3099_v41 = vpop.f32.mrb[22].mxu1  ;;  %3399 = vmatpush3.bf16.msra.mxu1 %v4986_v16  ;;  %v3078_v14 = vpop.f32.mrb[23].mxu0  ;;  %3378 = vmatprep.subr.bf16.mxu0 %v6028_v6  ;;  %v2808_v25 = vcombine.low %v5235_v28, %v5235_v28  ;;  %v5337_v6 = vld [vmem:[%s5792_s0 + $0xd0] sm:$0xff] }
 0x19a   :  { %v3100_v0 = vpop.f32.mrb[23].mxu1  ;;  %3400 = vmatprep.subr.bf16.mxu1 %v4993_v57 }
 0x19b   :  { %v1282_v37 = vadd.f32 %v3098_v27, %v3076_v11  ;;  %v2811_v27 = vcombine.high %v5337_v6, %v5337_v6 }
 0x19c   :  { %3379 = vmatpush3.bf16.msra.mxu0 %v6029_v8  ;;  %v5342_v8 = vld [vmem:[%s5792_s0 + $0xd8] sm:$0xff] }
 0x19d   :  { %3401 = vmatpush3.bf16.msra.mxu1 %v5003_v43  ;;  %3380 = vmatprep.subr.bf16.mxu0 %v6030_v7  ;;  %v5347_v7 = vld [vmem:[%s5791_s1 + $0x238] sm:$0xff]   ;;  %v2813_v11 = vcombine.high %v5342_v8, %v5342_v8 }
 0x19e   :  { %3402 = vmatprep.subr.bf16.mxu1 %v5010_v45 }
 0x1a0   :  { %3381 = vmatpush3.bf16.msra.mxu0 %v5347_v7 }
 0x1a1   :  { %3403 = vmatpush3.bf16.msra.mxu1 %v5031_v55  ;;  %3410 = vmatprep.subr.bf16.mxu0 %v4757_v13 }
 0x1a2   :  { %3432 = vmatprep.subr.bf16.mxu1 %v5038_v36 }
 0x1a3   :  { %1870 = vmatmul.mubr.bf16.vlgmr.msra.gmra.mrb[48].mxu0 %v2806_v20 }
 0x1a4   :  { %1945 = vmatmul.mubr.bf16.vlgmr.msra.gmra.mrb[48].mxu1 %v2808_v25  ;;  %3411 = vmatpush3.bf16.msra.mxu0 %v4768_v30 }
 0x1a5   :  { %3433 = vmatpush3.bf16.msra.mxu1 %v5054_v2  ;;  %3412 = vmatprep.subr.bf16.mxu0 %v4775_v38 }
 0x1a6   :  { %3434 = vmatprep.subr.bf16.mxu1 %v5066_v10  ;;  %1984 = vmatprep.mubr.bf16.mxu0 %v2811_v27 }
 0x1a7   :  { %2024 = vmatprep.mubr.bf16.mxu1 %v2813_v11  ;;  %v6076_v11 = vld [vmem:[#allocation32_spill] sm:$0xff] }
 0x1a8   :  { %3413 = vmatpush3.bf16.msra.mxu0 %v4782_v31 }
 0x1a9   :  { %3435 = vmatpush3.bf16.msra.mxu1 %v5078_v17  ;;  %3414 = vmatprep.subr.bf16.mxu0 %v4789_v40 }
 0x1aa   :  { %3436 = vmatprep.subr.bf16.mxu1 %v5090_v3 }
 0x1ac   :  { %3415 = vmatpush3.bf16.msra.mxu0 %v4796_v42 }
 0x1ad   :  { %3437 = vmatpush3.bf16.msra.mxu1 %v5102_v24  ;;  %3416 = vmatprep.subr.bf16.mxu0 %v4803_v44 }
 0x1ae   :  { %3438 = vmatprep.subr.bf16.mxu1 %v5114_v15 }
 0x1b0   :  { %3417 = vmatpush3.bf16.msra.mxu0 %v4810_v46 }
 0x1b1   :  { %3439 = vmatpush3.bf16.msra.mxu1 %v5126_v63  ;;  %3418 = vmatprep.subr.bf16.mxu0 %v4817_v48 }
 0x1b2   :  { %3440 = vmatprep.subr.bf16.mxu1 %v5138_v34 }
 0x1b4   :  { %3419 = vmatpush3.bf16.msra.mxu0 %v4824_v50 }
 0x1b5   :  { %3441 = vmatpush3.bf16.msra.mxu1 %v5152_v49  ;;  %3420 = vmatprep.subr.bf16.mxu0 %v4831_v52 }
 0x1b6   :  { %3442 = vmatprep.subr.bf16.mxu1 %v5164_v39  ;;  %v3118_v19 = vpop.f32.mrb[24].mxu0  ;;  %v6096_v39 = vld [vmem:[#allocation31_spill] sm:$0xff] }
 0x1b7   :  { %v3140_v14 = vpop.f32.mrb[24].mxu1  ;;  %v3119_v28 = vpop.f32.mrb[25].mxu0 }
 0x1b8   :  { %v3141_v32 = vpop.f32.mrb[25].mxu1  ;;  %v3120_v41 = vadd.f32 %v3119_v28, %v3118_v19  ;;  %v3121_v60 = vpop.f32.mrb[26].mxu0  ;;  %3421 = vmatpush3.bf16.msra.mxu0 %v4838_v56  ;;  %v6077_v19 = vld [vmem:[#allocation23_spill] sm:$0xff]  ;;  %v2810_v28 = vcombine.low %v5337_v6, %v5337_v6 }
 0x1b9   :  { %v3142_v9 = vadd.f32 %v3141_v32, %v3140_v14  ;;  %v3143_v12 = vpop.f32.mrb[26].mxu1  ;;  %3443 = vmatpush3.bf16.msra.mxu1 %v5176_v59  ;;  %v3122_v0 = vpop.f32.mrb[27].mxu0  ;;  %3422 = vmatprep.subr.bf16.mxu0 %v4845_v58  ;;  %v6078_v14 = vld [vmem:[#allocation34_spill] sm:$0xff]  ;;  %v2812_v32 = vcombine.low %v5342_v8, %v5342_v8  ;;  %v5392_v60 = vld [vmem:[%s5792_s0 + $0xe0] sm:$0xff]  ;;  %v6094_v59 = vld [vmem:[#allocation29_spill] sm:$0xff] }
 0x1ba   :  { %v3144_v20 = vpop.f32.mrb[27].mxu1  ;;  %3444 = vmatprep.subr.bf16.mxu1 %v5188_v4  ;;  %v1322_v25 = vadd.f32 %v3120_v41, %v1282_v37  ;;  %v5397_v37 = vld [vmem:[%s5792_s0 + $0xe8] sm:$0xff]  ;;  %v6079_v41 = vld [vmem:[#allocation3_spill] sm:$0xff]  ;;  %v2815_v6 = vcombine.high %v5392_v60, %v5392_v60  ;;  %v6082_v0 = vld [vmem:[#allocation9_spill] sm:$0xff] }
 0x1bb   :  { %v6081_v12 = vld [vmem:[#allocation8_spill] sm:$0xff]  ;;  %v2817_v8 = vcombine.high %v5397_v37, %v5397_v37  ;;  %v6083_v20 = vld [vmem:[#allocation10_spill] sm:$0xff] }
 0x1bc   :  { %v1362_v27 = vadd.f32 %v3142_v9, %v1322_v25  ;;  %3423 = vmatpush3.bf16.msra.mxu0 %v4853_v29  ;;  %v6080_v9 = vld [vmem:[#allocation36_spill] sm:$0xff]  ;;  %v6084_v25 = vld [vmem:[#allocation11_spill] sm:$0xff] }
 0x1bd   :  { %3445 = vmatpush3.bf16.msra.mxu1 %v6076_v11  ;;  %3424 = vmatprep.subr.bf16.mxu0 %v6077_v19 }
 0x1be   :  { %3446 = vmatprep.subr.bf16.mxu1 %v6078_v14 }
 0x1c0   :  { %3425 = vmatpush3.bf16.msra.mxu0 %v6079_v41 }
 0x1c1   :  { %3447 = vmatpush3.bf16.msra.mxu1 %v6080_v9  ;;  %3454 = vmatprep.subr.bf16.mxu0 %v6081_v12 }
 0x1c2   :  { %3476 = vmatprep.subr.bf16.mxu1 %v5252_v54  ;;  %v6085_v54 = vld [vmem:[#allocation12_spill] sm:$0xff] }
 0x1c3   :  { %1985 = vmatmul.mubr.bf16.vlgmr.msra.gmra.mrb[52].mxu0 %v2810_v28  ;;  %v6086_v28 = vld [vmem:[#allocation13_spill] sm:$0xff] }
 0x1c4   :  { %2025 = vmatmul.mubr.bf16.vlgmr.msra.gmra.mrb[52].mxu1 %v2812_v32  ;;  %3455 = vmatpush3.bf16.msra.mxu0 %v6082_v0  ;;  %v6087_v32 = vld [vmem:[#allocation14_spill] sm:$0xff] }
 0x1c5   :  { %3477 = vmatpush3.bf16.msra.mxu1 %v5263_v33  ;;  %3456 = vmatprep.subr.bf16.mxu0 %v6083_v20  ;;  %v6088_v33 = vld [vmem:[#allocation15_spill] sm:$0xff] }
 0x1c6   :  { %3478 = vmatprep.subr.bf16.mxu1 %v5270_v18  ;;  %2064 = vmatprep.mubr.bf16.mxu0 %v2815_v6  ;;  %v6089_v6 = vld [vmem:[#allocation16_spill] sm:$0xff] }
 0x1c7   :  { %2104 = vmatprep.mubr.bf16.mxu1 %v2817_v8  ;;  %v6090_v8 = vld [vmem:[#allocation17_spill] sm:$0xff] }
 0x1c8   :  { %3457 = vmatpush3.bf16.msra.mxu0 %v6084_v25 }
 0x1c9   :  { %3479 = vmatpush3.bf16.msra.mxu1 %v5277_v5  ;;  %3458 = vmatprep.subr.bf16.mxu0 %v6085_v54 }
 0x1ca   :  { %3480 = vmatprep.subr.bf16.mxu1 %v5284_v21  ;;  %v5427_v21 = vld [vmem:[%s5791_s1 + $0x220] sm:$0xff]  }
 0x1cb   :  { %6091 = vst [vmem:[#allocation23_spill] sm:$0xff] %v5427_v21 }
 0x1cc   :  { %3459 = vmatpush3.bf16.msra.mxu0 %v6086_v28 }
 0x1cd   :  { %3481 = vmatpush3.bf16.msra.mxu1 %v5293_v62  ;;  %3460 = vmatprep.subr.bf16.mxu0 %v6087_v32  ;;  %v6092_v62 = vld [vmem:[#allocation27_spill] sm:$0xff] }
 0x1ce   :  { %3482 = vmatprep.subr.bf16.mxu1 %v5300_v53  ;;  %v5434_v53 = vld [vmem:[%s5791_s1 + $0x268] sm:$0xff]  }
 0x1cf   :  { %6093 = vst [vmem:[#allocation3_spill] sm:$0xff] %v5434_v53 }
 0x1d0   :  { %3461 = vmatpush3.bf16.msra.mxu0 %v6088_v33 }
 0x1d1   :  { %3483 = vmatpush3.bf16.msra.mxu1 %v5307_v47  ;;  %3462 = vmatprep.subr.bf16.mxu0 %v6089_v6 }
 0x1d2   :  { %3484 = vmatprep.subr.bf16.mxu1 %v5314_v61 }
 0x1d4   :  { %3463 = vmatpush3.bf16.msra.mxu0 %v6090_v8 }
 0x1d5   :  { %3485 = vmatpush3.bf16.msra.mxu1 %v5427_v21  ;;  %3464 = vmatprep.subr.bf16.mxu0 %v6092_v62  ;;  %v5443_v21 = vld [vmem:[%s5791_s1 + $0x228] sm:$0xff]  }
 0x1d6   :  { %3486 = vmatprep.subr.bf16.mxu1 %v5434_v53  ;;  %v3162_v47 = vpop.f32.mrb[28].mxu0  ;;  %6095 = vst [vmem:[#allocation8_spill] sm:$0xff] %v5443_v21 }
 0x1d7   :  { %v3184_v61 = vpop.f32.mrb[28].mxu1  ;;  %v3163_v5 = vpop.f32.mrb[29].mxu0 }
 0x1d8   :  { %v3185_v18 = vpop.f32.mrb[29].mxu1  ;;  %v3164_v9 = vadd.f32 %v3163_v5, %v3162_v47  ;;  %v3165_v11 = vpop.f32.mrb[30].mxu0  ;;  %3465 = vmatpush3.bf16.msra.mxu0 %v6094_v59  ;;  %v6098_v47 = vld [vmem:[#allocation33_spill] sm:$0xff] }
 0x1d9   :  { %v5437_v14 = vadd.f32 %v3185_v18, %v3184_v61  ;;  %v3187_v4 = vpop.f32.mrb[30].mxu1  ;;  %3487 = vmatpush3.bf16.msra.mxu1 %v5443_v21  ;;  %v3166_v62 = vpop.f32.mrb[31].mxu0  ;;  %3466 = vmatprep.subr.bf16.mxu0 %v6096_v39  ;;  %v5450_v18 = vld [vmem:[%s5791_s1 + $0x270] sm:$0xff]   ;;  %v5465_v11 = vld [vmem:[%s5791_s1 + $0x278] sm:$0xff]  }
 0x1da   :  { %v3188_v53 = vpop.f32.mrb[31].mxu1  ;;  %6097 = vst [vmem:[#allocation9_spill] sm:$0xff] %v5450_v18  ;;  %3488 = vmatprep.subr.bf16.mxu1 %v5450_v18  ;;  %v1402_v4 = vadd.f32 %v3164_v9, %v1362_v27  ;;  %v5458_v61 = vld [vmem:[%s5791_s1 + $0x230] sm:$0xff]   ;;  %6101 = vst [vmem:[#allocation11_spill] sm:$0xff] %v5465_v11  ;;  %v2814_v9 = vcombine.low %v5392_v60, %v5392_v60  ;;  %v5480_v18 = vld [vmem:[%s5792_s0 + $0xf8] sm:$0xff] }
 0x1db   :  { %6099 = vst [vmem:[#allocation10_spill] sm:$0xff] %v5458_v61  ;;  %v6100_v53 = vld [vmem:[#allocation35_spill] sm:$0xff] }
 0x1dc   :  { %v2598_v5 = vsel %vm20_vm0, %v1402_v4, 0.0  ;;  %3467 = vmatpush3.bf16.msra.mxu0 %v6098_v47  ;;  %v2816_v4 = vcombine.low %v5397_v37, %v5397_v37  ;;  %v2821_v37 = vcombine.high %v5480_v18, %v5480_v18 }
 0x1dd   :  { %3489 = vmatpush3.bf16.msra.mxu1 %v5458_v61  ;;  %v2599_v62 = vrot.slane %v2598_v5, 4  ;;  %3468 = vmatprep.subr.bf16.mxu0 %v6100_v53  ;;  %v5475_v61 = vld [vmem:[%s5792_s0 + $0xf0] sm:$0xff] }
 0x1de   :  { %3490 = vmatprep.subr.bf16.mxu1 %v5465_v11  ;;  %v2819_v60 = vcombine.high %v5475_v61, %v5475_v61  ;;  %v6102_v11 = vld [vmem:[#allocation19_spill] sm:$0xff] }
 0x1df   :  { %v2600_v27 = vadd.f32 %v2599_v62, %v2598_v5 }
 0x1e0   :  { %3469 = vmatpush3.bf16.msra.mxu0 %v5246_v51 }
 0x1e1   :  { %3491 = vmatpush3.bf16.msra.mxu1 %v5347_v7  ;;  %v2601_v5 = vrot.slane %v2600_v27, 2  ;;  %3498 = vmatprep.subr.bf16.mxu0 %v6035_v26  ;;  %v6103_v26 = vld [vmem:[#allocation38_spill] sm:$0xff] }
 0x1e2   :  { %3520 = vmatprep.subr.bf16.mxu1 %v4757_v13 }
 0x1e3   :  { %v2602_v62 = vadd.f32 %v2601_v5, %v2600_v27  ;;  %2065 = vmatmul.mubr.bf16.vlgmr.msra.gmra.mrb[56].mxu0 %v2814_v9  ;;  %v6104_v9 = vld [vmem:[#allocation22_spill] sm:$0xff] }
 0x1e4   :  { %2105 = vmatmul.mubr.bf16.vlgmr.msra.gmra.mrb[56].mxu1 %v2816_v4  ;;  %3499 = vmatpush3.bf16.msra.mxu0 %v6102_v11 }
 0x1e5   :  { %3521 = vmatpush3.bf16.msra.mxu1 %v4768_v30  ;;  %v2603_v21 = vrot.slane %v2602_v62, 1  ;;  %3500 = vmatprep.subr.bf16.mxu0 %v6037_v23  ;;  %v6105_v30 = vld [vmem:[#allocation4_spill] sm:$0xff] }
 0x1e6   :  { %3522 = vmatprep.subr.bf16.mxu1 %v4775_v38  ;;  %2179 = vmatprep.mubr.bf16.mxu0 %v2819_v60  ;;  %v6106_v38 = vld [vmem:[#allocation5_spill] sm:$0xff]  ;;  %v2820_v60 = vcombine.low %v5480_v18, %v5480_v18  ;;  %v6110_v18 = vld [vmem:[#allocation27_spill] sm:$0xff] }
 0x1e7   :  { %2219 = vmatprep.mubr.bf16.mxu1 %v2821_v37  ;;  %v2604_v13 = vadd.f32 %v2603_v21, %v2602_v62  ;;  %v6107_v21 = vld [vmem:[#allocation6_spill] sm:$0xff] }
 0x1e8   :  { %3501 = vmatpush3.bf16.msra.mxu0 %v6038_v22 }
 0x1e9   :  { %3523 = vmatpush3.bf16.msra.mxu1 %v4782_v31  ;;  %v5497_v27 = vsel %vm2650_vm2, %v2604_v13, %v6103_v26  ;;  %3502 = vmatprep.subr.bf16.mxu0 %v6104_v9  ;;  %v6108_v31 = vld [vmem:[#allocation7_spill] sm:$0xff] }
 0x1ea   :  { %3524 = vmatprep.subr.bf16.mxu1 %v4789_v40 }
 0x1ec   :  { %3503 = vmatpush3.bf16.msra.mxu0 %v6105_v30 }
 0x1ed   :  { %3525 = vmatpush3.bf16.msra.mxu1 %v4796_v42  ;;  %3504 = vmatprep.subr.bf16.mxu0 %v6106_v38 }
 0x1ee   :  { %3526 = vmatprep.subr.bf16.mxu1 %v4803_v44 }
 0x1f0   :  { %3505 = vmatpush3.bf16.msra.mxu0 %v6107_v21 }
 0x1f1   :  { %3527 = vmatpush3.bf16.msra.mxu1 %v4810_v46  ;;  %3506 = vmatprep.subr.bf16.mxu0 %v6108_v31 }
 0x1f2   :  { %3528 = vmatprep.subr.bf16.mxu1 %v4817_v48 }
 0x1f4   :  { %3507 = vmatpush3.bf16.msra.mxu0 %v4972_v35 }
 0x1f5   :  { %3529 = vmatpush3.bf16.msra.mxu1 %v4824_v50  ;;  %3508 = vmatprep.subr.bf16.mxu0 %v4979_v1 }
 0x1f6   :  { %3530 = vmatprep.subr.bf16.mxu1 %v4831_v52  ;;  %v3206_v40 = vpop.f32.mrb[32].mxu0 }
 0x1f7   :  { %v3228_v42 = vpop.f32.mrb[32].mxu1  ;;  %v3207_v23 = vpop.f32.mrb[33].mxu0 }
 0x1f8   :  { %v3229_v44 = vpop.f32.mrb[33].mxu1  ;;  %v3208_v22 = vadd.f32 %v3207_v23, %v3206_v40  ;;  %v3209_v4 = vpop.f32.mrb[34].mxu0  ;;  %3509 = vmatpush3.bf16.msra.mxu0 %v4986_v16  ;;  %v6111_v23 = vld [vmem:[#allocation28_spill] sm:$0xff] }
 0x1f9   :  { %v3230_v11 = vadd.f32 %v3229_v44, %v3228_v42  ;;  %v3231_v46 = vpop.f32.mrb[34].mxu1  ;;  %3531 = vmatpush3.bf16.msra.mxu1 %v4838_v56  ;;  %v3210_v48 = vpop.f32.mrb[35].mxu0  ;;  %3510 = vmatprep.subr.bf16.mxu0 %v4993_v57  ;;  %v2818_v56 = vcombine.low %v5475_v61, %v5475_v61 }
 0x1fa   :  { %v3232_v5 = vpop.f32.mrb[35].mxu1  ;;  %3532 = vmatprep.subr.bf16.mxu1 %v4845_v58  ;;  %v1517_v50 = vadd.f32 %v3208_v22, %v5437_v14  ;;  %v5529_v58 = vld [vmem:[%s5792_s0 + $0x100] sm:$0xff]  ;;  %v5534_v14 = vld [vmem:[%s5792_s0 + $0x108] sm:$0xff] }
 0x1fb   :  { %v6113_v48 = vld [vmem:[#allocation32_spill] sm:$0xff]  ;;  %v6114_v5 = vld [vmem:[#allocation34_spill] sm:$0xff] }
 0x1fc   :  { %v1557_v52 = vadd.f32 %v3230_v11, %v1517_v50  ;;  %3511 = vmatpush3.bf16.msra.mxu0 %v5003_v43  ;;  %v6112_v11 = vld [vmem:[#allocation30_spill] sm:$0xff] }
 0x1fd   :  { %3533 = vmatpush3.bf16.msra.mxu1 %v4853_v29  ;;  %3512 = vmatprep.subr.bf16.mxu0 %v5010_v45  ;;  %v2823_v29 = vcombine.high %v5529_v58, %v5529_v58 }
 0x1fe   :  { %3534 = vmatprep.subr.bf16.mxu1 %v6077_v19  ;;  %v2825_v19 = vcombine.high %v5534_v14, %v5534_v14 }
 0x200   :  { %3513 = vmatpush3.bf16.msra.mxu0 %v5031_v55 }
 0x201   :  { %3535 = vmatpush3.bf16.msra.mxu1 %v6079_v41  ;;  %3542 = vmatprep.subr.bf16.mxu0 %v5038_v36  ;;  %v6109_v41 = vld [vmem:[#allocation26_spill] sm:$0xff] }
 0x202   :  { %3564 = vmatprep.subr.bf16.mxu1 %v6081_v12 }
 0x203   :  { %2180 = vmatmul.mubr.bf16.vlgmr.msra.gmra.mrb[60].mxu0 %v2818_v56 }
 0x204   :  { %2220 = vmatmul.mubr.bf16.vlgmr.msra.gmra.mrb[60].mxu1 %v2820_v60  ;;  %3543 = vmatpush3.bf16.msra.mxu0 %v5054_v2  ;;  %v2822_v60 = vcombine.low %v5529_v58, %v5529_v58  ;;  %v3959_v58 = vld [vmem:[%s5791_s1 + $0x40] sm:$0xff]  }
 0x205   :  { %3565 = vmatpush3.bf16.msra.mxu1 %v6082_v0  ;;  %3544 = vmatprep.subr.bf16.mxu0 %v5066_v10 }
 0x206   :  { %3566 = vmatprep.subr.bf16.mxu1 %v6083_v20  ;;  %2259 = vmatprep.mubr.bf16.mxu0 %v2823_v29  ;;  %v2824_v29 = vcombine.low %v5534_v14, %v5534_v14 }
 0x207   :  { %2299 = vmatprep.mubr.bf16.mxu1 %v2825_v19  ;;  %v5585_v19 = vld [vmem:[%s5792_s0 + $0x118] sm:$0xff] }
 0x208   :  { %3545 = vmatpush3.bf16.msra.mxu0 %v5078_v17 }
 0x209   :  { %3567 = vmatpush3.bf16.msra.mxu1 %v6084_v25  ;;  %3546 = vmatprep.subr.bf16.mxu0 %v5090_v3 }
 0x20a   :  { %3568 = vmatprep.subr.bf16.mxu1 %v6085_v54 }
 0x20c   :  { %3547 = vmatpush3.bf16.msra.mxu0 %v5102_v24 }
 0x20d   :  { %3569 = vmatpush3.bf16.msra.mxu1 %v6086_v28  ;;  %3548 = vmatprep.subr.bf16.mxu0 %v5114_v15 }
 0x20e   :  { %3570 = vmatprep.subr.bf16.mxu1 %v6087_v32 }
 0x210   :  { %3549 = vmatpush3.bf16.msra.mxu0 %v5126_v63 }
 0x211   :  { %3571 = vmatpush3.bf16.msra.mxu1 %v6088_v33  ;;  %3550 = vmatprep.subr.bf16.mxu0 %v5138_v34 }
 0x212   :  { %3572 = vmatprep.subr.bf16.mxu1 %v6089_v6 }
 0x214   :  { %3551 = vmatpush3.bf16.msra.mxu0 %v5152_v49 }
 0x215   :  { %3573 = vmatpush3.bf16.msra.mxu1 %v6090_v8  ;;  %3552 = vmatprep.subr.bf16.mxu0 %v6109_v41 }
 0x216   :  { %3574 = vmatprep.subr.bf16.mxu1 %v6110_v18  ;;  %v3250_v61 = vpop.f32.mrb[36].mxu0 }
 0x217   :  { %v3272_v37 = vpop.f32.mrb[36].mxu1  ;;  %v3251_v62 = vpop.f32.mrb[37].mxu0 }
 0x218   :  { %v3273_v13 = vpop.f32.mrb[37].mxu1  ;;  %v3252_v26 = vadd.f32 %v3251_v62, %v3250_v61  ;;  %v3253_v40 = vpop.f32.mrb[38].mxu0  ;;  %3553 = vmatpush3.bf16.msra.mxu0 %v6111_v23  ;;  %v6115_v61 = vld [vmem:[#allocation36_spill] sm:$0xff]  ;;  %v6116_v62 = vld [vmem:[#allocation25_spill] sm:$0xff] }
 0x219   :  { %v3274_v9 = vadd.f32 %v3273_v13, %v3272_v37  ;;  %v3275_v42 = vpop.f32.mrb[38].mxu1  ;;  %3575 = vmatpush3.bf16.msra.mxu1 %v6094_v59  ;;  %v3254_v44 = vpop.f32.mrb[39].mxu0  ;;  %3554 = vmatprep.subr.bf16.mxu0 %v6112_v11  ;;  %v2829_v13 = vcombine.high %v5585_v19, %v5585_v19  ;;  %v3960_v40 = vld [vmem:[%s5791_s1] sm:$0xff]  }
 0x21a   :  { %v3276_v22 = vpop.f32.mrb[39].mxu1  ;;  %3576 = vmatprep.subr.bf16.mxu1 %v6096_v39  ;;  %v1597_v4 = vadd.f32 %v3252_v26, %v1557_v52  ;;  %v5580_v52 = vld [vmem:[%s5792_s0 + $0x110] sm:$0xff]  ;;  %v6118_v44 = vld [vmem:[#allocation20_spill] sm:$0xff] }
 0x21b   :  { %v2827_v14 = vcombine.high %v5580_v52, %v5580_v52  ;;  %v3961_v22 = vld [vmem:[%s5791_s1 + $0x48] sm:$0xff]  }
 0x21c   :  { %v1637_v46 = vadd.f32 %v3274_v9, %v1597_v4  ;;  %3555 = vmatpush3.bf16.msra.mxu0 %v6113_v48  ;;  %v6117_v9 = vld [vmem:[#allocation18_spill] sm:$0xff] }
 0x21d   :  { %3577 = vmatpush3.bf16.msra.mxu1 %v6098_v47  ;;  %3556 = vmatprep.subr.bf16.mxu0 %v6114_v5 }
 0x21e   :  { %3578 = vmatprep.subr.bf16.mxu1 %v6100_v53  ;;  %v2605_v50 = vsel %vm20_vm0, %v1637_v46, 0.0  ;;  %v6119_v46 = vld [vmem:[#allocation21_spill] sm:$0xff] }
 0x21f   :  { %v2606_v56 = vrot.slane %v2605_v50, 4 }
 0x220   :  { %3557 = vmatpush3.bf16.msra.mxu0 %v6115_v61 }
 0x221   :  { %3579 = vmatpush3.bf16.msra.mxu1 %v5246_v51  ;;  %v2607_v37 = vadd.f32 %v2606_v56, %v2605_v50  ;;  %3586 = vmatprep.subr.bf16.mxu0 %v6116_v62  ;;  %v3962_v50 = vld [vmem:[%s5791_s1 + $0x8] sm:$0xff]   ;;  %v6129_v51 = vld [vmem:[#allocation9_spill] sm:$0xff] }
 0x222   :  { %3608 = vmatprep.subr.bf16.mxu1 %v3959_v58  ;;  %v6122_v58 = vld [vmem:[#allocation39_spill] sm:$0xff] }
 0x223   :  { %v2608_v26 = vrot.slane %v2607_v37, 2  ;;  %2260 = vmatmul.mubr.bf16.vlgmr.msra.gmra.mrb[64].mxu0 %v2822_v60  ;;  %v6120_v60 = vld [vmem:[#allocation37_spill] sm:$0xff] }
 0x224   :  { %2300 = vmatmul.mubr.bf16.vlgmr.msra.gmra.mrb[64].mxu1 %v2824_v29  ;;  %3587 = vmatpush3.bf16.msra.mxu0 %v6117_v9  ;;  %v3963_v29 = vld [vmem:[%s5791_s1 + $0x50] sm:$0xff]  }
 0x225   :  { %3609 = vmatpush3.bf16.msra.mxu1 %v3960_v40  ;;  %v2609_v42 = vadd.f32 %v2608_v26, %v2607_v37  ;;  %3588 = vmatprep.subr.bf16.mxu0 %v6118_v44  ;;  %v6125_v26 = vld [vmem:[#allocation42_spill] sm:$0xff]  ;;  %v6126_v40 = vld [vmem:[#allocation23_spill] sm:$0xff] }
 0x226   :  { %3610 = vmatprep.subr.bf16.mxu1 %v3961_v22  ;;  %2339 = vmatprep.mubr.bf16.mxu0 %v2827_v14  ;;  %v6123_v14 = vld [vmem:[#allocation40_spill] sm:$0xff] }
 0x227   :  { %2414 = vmatprep.mubr.bf16.mxu1 %v2829_v13  ;;  %v2610_v4 = vrot.slane %v2609_v42, 1  ;;  %v6124_v13 = vld [vmem:[#allocation41_spill] sm:$0xff] }
 0x228   :  { %3589 = vmatpush3.bf16.msra.mxu0 %v6119_v46 }
 0x229   :  { %3611 = vmatpush3.bf16.msra.mxu1 %v3962_v50  ;;  %v2611_v56 = vadd.f32 %v2610_v4, %v2609_v42  ;;  %3590 = vmatprep.subr.bf16.mxu0 %v6120_v60 }
 0x22a   :  { %3612 = vmatprep.subr.bf16.mxu1 %v3963_v29  ;;  %v6128_v29 = vld [vmem:[#allocation8_spill] sm:$0xff] }
 0x22b   :  { %v5614_v37 = vsel %vm2652_vm3, %v2611_v56, %v5497_v27  ;;  %v6127_v27 = vld [vmem:[#allocation3_spill] sm:$0xff] }
 0x22c   :  { %6121 = vst [vmem:[#allocation12_spill] sm:$0xff] %v5614_v37  ;;  %3591 = vmatpush3.bf16.msra.mxu0 %v6122_v58 }
 0x22d   :  { %3613 = vmatpush3.bf16.msra.mxu1 %v6105_v30  ;;  %3592 = vmatprep.subr.bf16.mxu0 %v6123_v14 }
 0x22e   :  { %3614 = vmatprep.subr.bf16.mxu1 %v6106_v38 }
 0x230   :  { %3593 = vmatpush3.bf16.msra.mxu0 %v6124_v13 }
 0x231   :  { %3615 = vmatpush3.bf16.msra.mxu1 %v6107_v21  ;;  %3594 = vmatprep.subr.bf16.mxu0 %v6125_v26 }
 0x232   :  { %3616 = vmatprep.subr.bf16.mxu1 %v6108_v31 }
 0x234   :  { %3595 = vmatpush3.bf16.msra.mxu0 %v6126_v40 }
 0x235   :  { %3617 = vmatpush3.bf16.msra.mxu1 %v4972_v35  ;;  %3596 = vmatprep.subr.bf16.mxu0 %v6127_v27 }
 0x236   :  { %3618 = vmatprep.subr.bf16.mxu1 %v4979_v1  ;;  %v3294_v30 = vpop.f32.mrb[40].mxu0  ;;  %v6130_v1 = vld [vmem:[#allocation10_spill] sm:$0xff] }
 0x237   :  { %v3316_v42 = vpop.f32.mrb[40].mxu1  ;;  %v3295_v22 = vpop.f32.mrb[41].mxu0 }
 0x238   :  { %v3317_v38 = vpop.f32.mrb[41].mxu1  ;;  %v3296_v4 = vadd.f32 %v3295_v22, %v3294_v30  ;;  %v3297_v56 = vpop.f32.mrb[42].mxu0  ;;  %3597 = vmatpush3.bf16.msra.mxu0 %v6128_v29  ;;  %v6131_v30 = vld [vmem:[#allocation11_spill] sm:$0xff]  ;;  %v3970_v22 = vld [vmem:[%s5791_s1 + $0xd8] sm:$0xff]  }
 0x239   :  { %v3318_v50 = vadd.f32 %v3317_v38, %v3316_v42  ;;  %v3319_v21 = vpop.f32.mrb[42].mxu1  ;;  %3619 = vmatpush3.bf16.msra.mxu1 %v4986_v16  ;;  %v3298_v31 = vpop.f32.mrb[43].mxu0  ;;  %3598 = vmatprep.subr.bf16.mxu0 %v6129_v51  ;;  %v2826_v42 = vcombine.low %v5580_v52, %v5580_v52  ;;  %v2828_v16 = vcombine.low %v5585_v19, %v5585_v19  ;;  %v3965_v19 = vld [vmem:[%s5791_s1 + $0x80] sm:$0xff]  }
 0x23a   :  { %v3320_v37 = vpop.f32.mrb[43].mxu1  ;;  %3620 = vmatprep.subr.bf16.mxu1 %v4993_v57  ;;  %v5645_v57 = vld [vmem:[%s5792_s0 + $0x120] sm:$0xff] }
 0x23b   :  { %v5632_v35 = vadd.f32 %v3318_v50, %v3296_v4  ;;  %v5650_v37 = vld [vmem:[%s5792_s0 + $0x128] sm:$0xff] }
 0x23c   :  { %3599 = vmatpush3.bf16.msra.mxu0 %v6130_v1  ;;  %v2833_v52 = vcombine.high %v5650_v37, %v5650_v37 }
 0x23d   :  { %3621 = vmatpush3.bf16.msra.mxu1 %v5003_v43  ;;  %3600 = vmatprep.subr.bf16.mxu0 %v6131_v30  ;;  %v3964_v43 = vld [vmem:[%s5791_s1 + $0xc0] sm:$0xff]  }
 0x23e   :  { %3622 = vmatprep.subr.bf16.mxu1 %v5010_v45  ;;  %v2831_v45 = vcombine.high %v5645_v57, %v5645_v57 }
 0x240   :  { %3601 = vmatpush3.bf16.msra.mxu0 %v5347_v7 }
 0x241   :  { %3623 = vmatpush3.bf16.msra.mxu1 %v5031_v55  ;;  %3630 = vmatprep.subr.bf16.mxu0 %v3964_v43  ;;  %v3966_v55 = vld [vmem:[%s5791_s1 + $0xc8] sm:$0xff]  }
 0x242   :  { %3652 = vmatprep.subr.bf16.mxu1 %v5038_v36  ;;  %v3967_v36 = vld [vmem:[%s5791_s1 + $0x88] sm:$0xff]  }
 0x243   :  { %2340 = vmatmul.mubr.bf16.vlgmr.msra.gmra.mrb[68].mxu0 %v2826_v42  ;;  %v3975_v42 = vld [vmem:[%s5791_s1 + $0xa8] sm:$0xff]  }
 0x244   :  { %2415 = vmatmul.mubr.bf16.vlgmr.msra.gmra.mrb[68].mxu1 %v2828_v16  ;;  %3631 = vmatpush3.bf16.msra.mxu0 %v3965_v19  ;;  %v220_v19 = vld [vmem:[%s5792_s0 + $0x130] sm:$0xff] }
 0x245   :  { %3653 = vmatpush3.bf16.msra.mxu1 %v5054_v2  ;;  %3632 = vmatprep.subr.bf16.mxu0 %v3966_v55  ;;  %v3968_v2 = vld [vmem:[%s5791_s1 + $0xd0] sm:$0xff]   ;;  %v3979_v55 = vld [vmem:[%s5791_s1 + $0xb8] sm:$0xff]  }
 0x246   :  { %3654 = vmatprep.subr.bf16.mxu1 %v5066_v10  ;;  %2454 = vmatprep.mubr.bf16.mxu0 %v2831_v45  ;;  %v3969_v10 = vld [vmem:[%s5791_s1 + $0x90] sm:$0xff]  }
 0x247   :  { %2494 = vmatprep.mubr.bf16.mxu1 %v2833_v52  ;;  %v3977_v52 = vld [vmem:[%s5791_s1 + $0xb0] sm:$0xff]  }
 0x248   :  { %3633 = vmatpush3.bf16.msra.mxu0 %v3967_v36 }
 0x249   :  { %3655 = vmatpush3.bf16.msra.mxu1 %v5078_v17  ;;  %3634 = vmatprep.subr.bf16.mxu0 %v3968_v2  ;;  %v3971_v17 = vld [vmem:[%s5791_s1 + $0x98] sm:$0xff]  }
 0x24a   :  { %3656 = vmatprep.subr.bf16.mxu1 %v5090_v3  ;;  %v3972_v3 = vld [vmem:[%s5791_s1 + $0xe0] sm:$0xff]  }
 0x24c   :  { %3635 = vmatpush3.bf16.msra.mxu0 %v3969_v10 }
 0x24d   :  { %3657 = vmatpush3.bf16.msra.mxu1 %v5102_v24  ;;  %3636 = vmatprep.subr.bf16.mxu0 %v3970_v22  ;;  %v3973_v24 = vld [vmem:[%s5791_s1 + $0xa0] sm:$0xff]  }
 0x24e   :  { %3658 = vmatprep.subr.bf16.mxu1 %v5114_v15  ;;  %v3974_v15 = vld [vmem:[%s5791_s1 + $0xe8] sm:$0xff]  }
 0x250   :  { %3637 = vmatpush3.bf16.msra.mxu0 %v3971_v17 }
 0x251   :  { %3659 = vmatpush3.bf16.msra.mxu1 %v5126_v63  ;;  %3638 = vmatprep.subr.bf16.mxu0 %v3972_v3 }
 0x252   :  { %3660 = vmatprep.subr.bf16.mxu1 %v5138_v34 }
 0x254   :  { %3639 = vmatpush3.bf16.msra.mxu0 %v3973_v24 }
 0x255   :  { %3661 = vmatpush3.bf16.msra.mxu1 %v5152_v49  ;;  %3640 = vmatprep.subr.bf16.mxu0 %v3974_v15 }
 0x256   :  { %3662 = vmatprep.subr.bf16.mxu1 %v6109_v41  ;;  %v3338_v63 = vpop.f32.mrb[44].mxu0  ;;  %v3976_v41 = vld [vmem:[%s5791_s1 + $0xf0] sm:$0xff]  }
 0x257   :  { %v3360_v38 = vpop.f32.mrb[44].mxu1  ;;  %v3339_v4 = vpop.f32.mrb[45].mxu0 }
 0x258   :  { %v3361_v50 = vpop.f32.mrb[45].mxu1  ;;  %v3340_v56 = vadd.f32 %v3339_v4, %v3338_v63  ;;  %v3341_v21 = vpop.f32.mrb[46].mxu0  ;;  %3641 = vmatpush3.bf16.msra.mxu0 %v3975_v42 }
 0x259   :  { %v3362_v34 = vadd.f32 %v3361_v50, %v3360_v38  ;;  %v3363_v31 = vpop.f32.mrb[46].mxu1  ;;  %3663 = vmatpush3.bf16.msra.mxu1 %v6111_v23  ;;  %v3342_v49 = vpop.f32.mrb[47].mxu0  ;;  %3642 = vmatprep.subr.bf16.mxu0 %v3976_v41  ;;  %v3978_v23 = vld [vmem:[%s5791_s1 + $0xf8] sm:$0xff]  }
 0x25a   :  { %v3364_v16 = vpop.f32.mrb[47].mxu1  ;;  %3664 = vmatprep.subr.bf16.mxu1 %v6112_v11  ;;  %v1792_v43 = vadd.f32 %v3340_v56, %v5632_v35  ;;  %v2830_v11 = vcombine.low %v5645_v57, %v5645_v57  ;;  %v2832_v35 = vcombine.low %v5650_v37, %v5650_v37 }
 0x25c   :  { %v1832_v45 = vadd.f32 %v3362_v34, %v1792_v43  ;;  %3643 = vmatpush3.bf16.msra.mxu0 %v3977_v52 }
 0x25d   :  { %3665 = vmatpush3.bf16.msra.mxu1 %v6113_v48  ;;  %3644 = vmatprep.subr.bf16.mxu0 %v3978_v23  ;;  %v221_v48 = vld [vmem:[%s5792_s0 + $0x138] sm:$0xff] }
 0x25e   :  { %3666 = vmatprep.subr.bf16.mxu1 %v6114_v5  ;;  %v2835_v5 = vcombine.high %v220_v19, %v220_v19  ;;  %v2837_v57 = vcombine.high %v221_v48, %v221_v48 }
 0x260   :  { %3645 = vmatpush3.bf16.msra.mxu0 %v3979_v55 }
 0x261   :  { %3667 = vmatpush3.bf16.msra.mxu1 %v6115_v61  ;;  %3674 = vmatprep.subr.bf16.mxu0 %v6081_v12 }
 0x262   :  { %3696 = vmatprep.subr.bf16.mxu1 %v6116_v62 }
 0x263   :  { %2455 = vmatmul.mubr.bf16.vlgmr.msra.gmra.mrb[72].mxu0 %v2830_v11 }
 0x264   :  { %2495 = vmatmul.mubr.bf16.vlgmr.msra.gmra.mrb[72].mxu1 %v2832_v35  ;;  %3675 = vmatpush3.bf16.msra.mxu0 %v6082_v0 }
 0x265   :  { %3697 = vmatpush3.bf16.msra.mxu1 %v6117_v9  ;;  %3676 = vmatprep.subr.bf16.mxu0 %v6083_v20  ;;  %v2834_v9 = vcombine.low %v220_v19, %v220_v19 }
 0x266   :  { %3698 = vmatprep.subr.bf16.mxu1 %v6118_v44  ;;  %2534 = vmatprep.mubr.bf16.mxu0 %v2835_v5  ;;  %v2836_v44 = vcombine.low %v221_v48, %v221_v48 }
 0x267   :  { %2574 = vmatprep.mubr.bf16.mxu1 %v2837_v57 }
 0x268   :  { %3677 = vmatpush3.bf16.msra.mxu0 %v6084_v25 }
 0x269   :  { %3699 = vmatpush3.bf16.msra.mxu1 %v6119_v46  ;;  %3678 = vmatprep.subr.bf16.mxu0 %v6085_v54  ;;  %v6132_v46 = vld [vmem:[#allocation24_spill] sm:$0xff] }
 0x26a   :  { %3700 = vmatprep.subr.bf16.mxu1 %v6120_v60 }
 0x26c   :  { %3679 = vmatpush3.bf16.msra.mxu0 %v6086_v28 }
 0x26d   :  { %3701 = vmatpush3.bf16.msra.mxu1 %v6122_v58  ;;  %3680 = vmatprep.subr.bf16.mxu0 %v6087_v32  ;;  %v6133_v58 = vld [vmem:[#allocation12_spill] sm:$0xff] }
 0x26e   :  { %3702 = vmatprep.subr.bf16.mxu1 %v6123_v14 }
 0x270   :  { %3681 = vmatpush3.bf16.msra.mxu0 %v6088_v33 }
 0x271   :  { %3703 = vmatpush3.bf16.msra.mxu1 %v6124_v13  ;;  %3682 = vmatprep.subr.bf16.mxu0 %v6089_v6 }
 0x272   :  { %3704 = vmatprep.subr.bf16.mxu1 %v6125_v26 }
 0x274   :  { %3683 = vmatpush3.bf16.msra.mxu0 %v6090_v8 }
 0x275   :  { %3705 = vmatpush3.bf16.msra.mxu1 %v6126_v40  ;;  %3684 = vmatprep.subr.bf16.mxu0 %v6110_v18 }
 0x276   :  { %3706 = vmatprep.subr.bf16.mxu1 %v6127_v27  ;;  %v3382_v54 = vpop.f32.mrb[48].mxu0 }
 0x277   :  { %v3404_v12 = vpop.f32.mrb[48].mxu1  ;;  %v3383_v0 = vpop.f32.mrb[49].mxu0 }
 0x278   :  { %v3405_v20 = vpop.f32.mrb[49].mxu1  ;;  %v3384_v25 = vadd.f32 %v3383_v0, %v3382_v54  ;;  %v3385_v28 = vpop.f32.mrb[50].mxu0  ;;  %3685 = vmatpush3.bf16.msra.mxu0 %v6094_v59  ;;  %v3980_v0 = vmov 0.0  }
 0x279   :  { %v3406_v33 = vadd.f32 %v3405_v20, %v3404_v12  ;;  %v3407_v32 = vpop.f32.mrb[50].mxu1  ;;  %3707 = vmatpush3.bf16.msra.mxu1 %v6128_v29  ;;  %v3386_v6 = vpop.f32.mrb[51].mxu0  ;;  %3686 = vmatprep.subr.bf16.mxu0 %v6096_v39  ;;  %21 = vst.msk [vmem:[%s5793_s3] sm:$0xff] %vm20_vm0, %v3980_v0 }
 0x27a   :  { %v3408_v8 = vpop.f32.mrb[51].mxu1  ;;  %3708 = vmatprep.subr.bf16.mxu1 %v6129_v51  ;;  %v1872_v18 = vadd.f32 %v3384_v25, %v1832_v45 }
 0x27c   :  { %v2612_v61 = vsel %vm20_vm0, %v1872_v18, 0.0  ;;  %3687 = vmatpush3.bf16.msra.mxu0 %v6098_v47 }
 0x27d   :  { %3709 = vmatpush3.bf16.msra.mxu1 %v6130_v1  ;;  %v2613_v62 = vrot.slane %v2612_v61, 4  ;;  %3688 = vmatprep.subr.bf16.mxu0 %v6100_v53 }
 0x27e   :  { %3710 = vmatprep.subr.bf16.mxu1 %v6131_v30 }
 0x27f   :  { %v2614_v59 = vadd.f32 %v2613_v62, %v2612_v61 }
 0x280   :  { %3689 = vmatpush3.bf16.msra.mxu0 %v6132_v46 }
 0x281   :  { %3711 = vmatpush3.bf16.msra.mxu1 %v5347_v7  ;;  %v2615_v39 = vrot.slane %v2614_v59, 2 }
 0x283   :  { %v2616_v51 = vadd.f32 %v2615_v39, %v2614_v59  ;;  %2535 = vmatmul.mubr.bf16.vlgmr.msra.gmra.mrb[76].mxu0 %v2834_v9 }
 0x284   :  { %2575 = vmatmul.mubr.bf16.vlgmr.msra.gmra.mrb[76].mxu1 %v2836_v44 }
 0x285   :  { %v2617_v60 = vrot.slane %v2616_v51, 1 }
 0x287   :  { %v2618_v47 = vadd.f32 %v2617_v60, %v2616_v51 }
 0x289   :  { %v2655_v14 = vsel %vm2654_vm4, %v2618_v47, %v6133_v58 }
 0x296   :  { %v3426_v13 = vpop.f32.mrb[52].mxu0 }
 0x297   :  { %v3448_v53 = vpop.f32.mrb[52].mxu1  ;;  %v3427_v26 = vpop.f32.mrb[53].mxu0 }
 0x298   :  { %v3449_v40 = vpop.f32.mrb[53].mxu1  ;;  %v3428_v27 = vadd.f32 %v3427_v26, %v3426_v13  ;;  %v3429_v1 = vpop.f32.mrb[54].mxu0 }
 0x299   :  { %v3450_v29 = vadd.f32 %v3449_v40, %v3448_v53  ;;  %v3451_v30 = vpop.f32.mrb[54].mxu1  ;;  %v3430_v37 = vpop.f32.mrb[55].mxu0 }
 0x29a   :  { %v3452_v36 = vpop.f32.mrb[55].mxu1  ;;  %v1987_v7 = vadd.f32 %v3428_v27, %v3406_v33 }
 0x29c   :  { %v2027_v2 = vadd.f32 %v3450_v29, %v1987_v7 }
 0x2b6   :  { %v3470_v10 = vpop.f32.mrb[56].mxu0 }
 0x2b7   :  { %v3492_v22 = vpop.f32.mrb[56].mxu1  ;;  %v3471_v17 = vpop.f32.mrb[57].mxu0 }
 0x2b8   :  { %v3493_v3 = vpop.f32.mrb[57].mxu1  ;;  %v3472_v24 = vadd.f32 %v3471_v17, %v3470_v10  ;;  %v3473_v63 = vpop.f32.mrb[58].mxu0 }
 0x2b9   :  { %v3494_v15 = vadd.f32 %v3493_v3, %v3492_v22  ;;  %v3495_v38 = vpop.f32.mrb[58].mxu1  ;;  %v3474_v4 = vpop.f32.mrb[59].mxu0 }
 0x2ba   :  { %v3496_v50 = vpop.f32.mrb[59].mxu1  ;;  %v2067_v56 = vadd.f32 %v3472_v24, %v2027_v2 }
 0x2bc   :  { %v2107_v34 = vadd.f32 %v3494_v15, %v2067_v56 }
 0x2be   :  { %v2619_v21 = vsel %vm20_vm0, %v2107_v34, 0.0 }
 0x2bf   :  { %v2620_v31 = vrot.slane %v2619_v21, 4 }
 0x2c1   :  { %v2621_v42 = vadd.f32 %v2620_v31, %v2619_v21 }
 0x2c3   :  { %v2622_v49 = vrot.slane %v2621_v42, 2 }
 0x2c5   :  { %v2623_v16 = vadd.f32 %v2622_v49, %v2621_v42 }
 0x2c7   :  { %v2624_v41 = vrot.slane %v2623_v16, 1 }
 0x2c9   :  { %v2625_v43 = vadd.f32 %v2624_v41, %v2623_v16 }
 0x2cb   :  { %v2657_v45 = vsel %vm2656_vm5, %v2625_v43, %v2655_v14 }
 0x2d6   :  { %v3514_v52 = vpop.f32.mrb[60].mxu0 }
 0x2d7   :  { %v3536_v23 = vpop.f32.mrb[60].mxu1  ;;  %v3515_v11 = vpop.f32.mrb[61].mxu0 }
 0x2d8   :  { %v3537_v35 = vpop.f32.mrb[61].mxu1  ;;  %v3516_v19 = vadd.f32 %v3515_v11, %v3514_v52  ;;  %v3517_v55 = vpop.f32.mrb[62].mxu0 }
 0x2d9   :  { %v3538_v48 = vadd.f32 %v3537_v35, %v3536_v23  ;;  %v3539_v5 = vpop.f32.mrb[62].mxu1  ;;  %v3518_v57 = vpop.f32.mrb[63].mxu0 }
 0x2da   :  { %v3540_v54 = vpop.f32.mrb[63].mxu1 }
 0x2db   :  { %v2222_v12 = vadd.f32 %v3538_v48, %v3516_v19  ;;  %v2582_v54 = vld [vmem:[%s5793_s3] sm:$0xff] }
 0x2f6   :  { %v3558_v20 = vpop.f32.mrb[64].mxu0 }
 0x2f7   :  { %v3580_v25 = vpop.f32.mrb[64].mxu1  ;;  %v3559_v33 = vpop.f32.mrb[65].mxu0 }
 0x2f8   :  { %v3581_v28 = vpop.f32.mrb[65].mxu1  ;;  %v3560_v32 = vadd.f32 %v3559_v33, %v3558_v20  ;;  %v3561_v8 = vpop.f32.mrb[66].mxu0  ;;  %v2671_v33 = vstv %s5794_s2 }
 0x2f9   :  { %v3582_v6 = vadd.f32 %v3581_v28, %v3580_v25  ;;  %v3583_v18 = vpop.f32.mrb[66].mxu1  ;;  %v3562_v61 = vpop.f32.mrb[67].mxu0 }
 0x2fa   :  { %v3584_v62 = vpop.f32.mrb[67].mxu1  ;;  %v2262_v59 = vadd.f32 %v3560_v32, %v2222_v12 }
 0x2fc   :  { %v2302_v9 = vadd.f32 %v3582_v6, %v2262_v59 }
 0x316   :  { %v3602_v44 = vpop.f32.mrb[68].mxu0 }
 0x317   :  { %v3624_v46 = vpop.f32.mrb[68].mxu1  ;;  %v3603_v39 = vpop.f32.mrb[69].mxu0 }
 0x318   :  { %v3625_v51 = vpop.f32.mrb[69].mxu1  ;;  %v3604_v60 = vadd.f32 %v3603_v39, %v3602_v44  ;;  %v3605_v58 = vpop.f32.mrb[70].mxu0 }
 0x319   :  { %v3626_v47 = vadd.f32 %v3625_v51, %v3624_v46  ;;  %v3627_v14 = vpop.f32.mrb[70].mxu1  ;;  %v3606_v13 = vpop.f32.mrb[71].mxu0 }
 0x31a   :  { %v3628_v53 = vpop.f32.mrb[71].mxu1  ;;  %v2342_v26 = vadd.f32 %v3604_v60, %v2302_v9 }
 0x31c   :  { %v2626_v40 = vsel %vm20_vm0, %v2342_v26, 0.0 }
 0x31d   :  { %v2627_v27 = vrot.slane %v2626_v40, 4 }
 0x31f   :  { %v2628_v29 = vadd.f32 %v2627_v27, %v2626_v40 }
 0x321   :  { %v2629_v1 = vrot.slane %v2628_v29, 2 }
 0x323   :  { %v2630_v30 = vadd.f32 %v2629_v1, %v2628_v29 }
 0x325   :  { %v2631_v37 = vrot.slane %v2630_v30, 1 }
 0x327   :  { %v2632_v36 = vadd.f32 %v2631_v37, %v2630_v30 }
 0x329   :  { %v2659_v7 = vsel %vm2658_vm6, %v2632_v36, %v2657_v45 }
 0x336   :  { %v3646_v2 = vpop.f32.mrb[72].mxu0 }
 0x337   :  { %v3668_v10 = vpop.f32.mrb[72].mxu1  ;;  %v3647_v22 = vpop.f32.mrb[73].mxu0 }
 0x338   :  { %v3669_v17 = vpop.f32.mrb[73].mxu1  ;;  %v3648_v3 = vadd.f32 %v3647_v22, %v3646_v2  ;;  %v3649_v15 = vpop.f32.mrb[74].mxu0 }
 0x339   :  { %v3670_v24 = vadd.f32 %v3669_v17, %v3668_v10  ;;  %v3671_v63 = vpop.f32.mrb[74].mxu1  ;;  %v3650_v38 = vpop.f32.mrb[75].mxu0 }
 0x33a   :  { %v3672_v4 = vpop.f32.mrb[75].mxu1  ;;  %v2457_v50 = vadd.f32 %v3648_v3, %v3626_v47 }
 0x33c   :  { %v2497_v56 = vadd.f32 %v3670_v24, %v2457_v50 }
 0x356   :  { %v3690_v34 = vpop.f32.mrb[76].mxu0 }
 0x357   :  { %v3712_v21 = vpop.f32.mrb[76].mxu1  ;;  %v3691_v31 = vpop.f32.mrb[77].mxu0 }
 0x358   :  { %v3713_v42 = vpop.f32.mrb[77].mxu1  ;;  %v3692_v49 = vadd.f32 %v3691_v31, %v3690_v34  ;;  %v3693_v41 = vpop.f32.mrb[78].mxu0 }
 0x359   :  { %v3714_v16 = vadd.f32 %v3713_v42, %v3712_v21  ;;  %v3715_v43 = vpop.f32.mrb[78].mxu1  ;;  %v3694_v45 = vpop.f32.mrb[79].mxu0 }
 0x35a   :  { %v3716_v52 = vpop.f32.mrb[79].mxu1  ;;  %v2537_v23 = vadd.f32 %v3692_v49, %v2497_v56 }
 0x35c   :  { %v2577_v11 = vadd.f32 %v3714_v16, %v2537_v23 }
 0x35e   :  { %v2633_v35 = vsel %vm20_vm0, %v2577_v11, 0.0 }
 0x35f   :  { %v2634_v19 = vrot.slane %v2633_v35, 4 }
 0x361   :  { %v2635_v48 = vadd.f32 %v2634_v19, %v2633_v35 }
 0x363   :  { %v2636_v55 = vrot.slane %v2635_v48, 2 }
 0x365   :  { %v2637_v5 = vadd.f32 %v2636_v55, %v2635_v48 }
 0x367   :  { %v2638_v57 = vrot.slane %v2637_v5, 1 }
 0x369   :  { %v2639_v12 = vadd.f32 %v2638_v57, %v2637_v5 }
 0x36b   :  { %v2661_v0 = vsel %vm2660_vm7, %v2639_v12, %v2659_v7 }
 0x36c   :  { %v2663_v20 = vadd.f32 %v2661_v0, %v2582_v54 }
 0x36e   :  { %2664 = vst.msk [vmem:[%s5793_s3] sm:$0xff] %vm20_vm0, %v2663_v20 }
 0x375   :  { %v2668_v25 = vld [vmem:[%s5793_s3] sm:$0xff] }
 0x376   :  { %v2669_v28 = vmul.f32 0.125, %v2668_v25 }
 0x378   :  { %v2672_v32 = vadd.f32 %v2671_v33, %v2669_v28 }
 0x37a   :  { %2673 = vst.msk [vmem:[%s5793_s3] sm:$0xff] %vm20_vm0, %v2672_v32 }

</bundles_post_ra>
